<compile_context>
chip_gen: v7x
topology: tpu7x:2x2x1
jax: 0.10.0
libtpu: 0.0.40
codegen_flags: <defaults>
</compile_context>

<pallas_src>
import functools
import math

import jax
import jax.numpy as jnp
from jax import lax
from jax.experimental import pallas as pl
from jax.experimental.pallas import tpu as pltpu


# ----------------------------------------------------------------------------
# fused decoder-layer kernel (single invocation for the whole batch)
# ----------------------------------------------------------------------------
def _mm_t(x, w):
    """x: (T, K) times w.T where w is (Nout, K) (PyTorch Linear layout).
    No transpose is materialized; contraction dims go straight to the MXU."""
    return lax.dot_general(x, w, (((1,), (1,)), ((), ())),
                           preferred_element_type=jnp.float32)


def decoder_layer_kernel(tgt_ref, mem_ref, wqkv_ref, bqkv_ref, wot_ref,
                         w1_ref, b1_ref, w2_ref, vec_ref, o_ref,
                         *, nhead, n_batch, scale):
    E = wot_ref.shape[0]
    hd = E // nhead
    Tq = tgt_ref.shape[0]      # = L * N  (flattened tgt tokens, batch fastest)
    Tk = mem_ref.shape[0]      # = S * N  (flattened memory tokens, batch fastest)

    x_t = tgt_ref[...]         # (Tq, E) in stored dtype
    x_m = mem_ref[...]         # (Tk, E)

    def ln(x, g, b):           # LayerNorm over last dim, f32 math, eps = 1e-5
        xf = x.astype(jnp.float32)
        mu = jnp.mean(xf, axis=-1, keepdims=True)
        xc = xf - mu
        var = jnp.mean(xc * xc, axis=-1, keepdims=True)
        return xc * lax.rsqrt(var + 1e-5) * g + b

    # vec table rows: 0 n1w, 1 n1b, 2 n2w, 3 n2b, 4 n3w, 5 n3b, 6 out_proj_b, 7 lin2_b
    mem_n = ln(x_m, vec_ref[2:3, :], vec_ref[3:4, :])      # norm2(memory)  (Tk, E) f32
    tgt_n = ln(x_t, vec_ref[0:1, :], vec_ref[1:2, :])      # norm1(tgt)     (Tq, E) f32

    # Cross-batch mask: flattened token r belongs to batch (r % n_batch); attention is
    # only valid within the same batch.  Computing the dense (Tq, Tk) score matrix and
    # masking keeps every matmul lane/sublane-dense (no strided per-batch gathers), while
    # the softmax stays exact per (batch, head).
    # TODO(synk): for large batch counts switch to a head-batched dot_general (the masked
    # variant does N x the score FLOPs, negligible at TOPIQ's small N/L/S).
    qb = lax.broadcasted_iota(jnp.int32, (Tq, Tk), 0) % n_batch
    kb = lax.broadcasted_iota(jnp.int32, (Tq, Tk), 1) % n_batch
    mask_bias = jnp.where(qb == kb, jnp.float32(0.0), jnp.float32(-1e30))

    acc = jnp.zeros((Tq, E), jnp.float32)
    for h in range(nhead):     # static loop; all slices below are sublane-aligned ref views
        wq_h = wqkv_ref[h * hd:(h + 1) * hd, :]                     # (hd, E)
        wk_h = wqkv_ref[E + h * hd:E + (h + 1) * hd, :]             # (hd, E)
        wv_h = wqkv_ref[2 * E + h * hd:2 * E + (h + 1) * hd, :]     # (hd, E)
        bq_h = bqkv_ref[h:h + 1, :]                                 # (1, hd)
        bk_h = bqkv_ref[nhead + h:nhead + h + 1, :]
        bv_h = bqkv_ref[2 * nhead + h:2 * nhead + h + 1, :]

        q_h = (_mm_t(tgt_n, wq_h) + bq_h) * scale                   # (Tq, hd)
        k_h = _mm_t(mem_n, wk_h) + bk_h                             # (Tk, hd)
        v_h = _mm_t(mem_n, wv_h) + bv_h                             # (Tk, hd)

        s = lax.dot_general(q_h, k_h, (((1,), (1,)), ((), ())),
                            preferred_element_type=jnp.float32)     # (Tq, Tk)
        s = s + mask_bias
        s = s - jnp.max(s, axis=-1, keepdims=True)
        p = jnp.exp(s)
        p = p * pl.reciprocal(jnp.sum(p, axis=-1, keepdims=True), approx=True)
        o_h = jnp.dot(p, v_h, preferred_element_type=jnp.float32)   # (Tq, hd)

        # Fold head h directly into the out-projection (wo_t = out_proj_w.T), so no
        # per-head lane concatenate is materialized.
        acc = acc + jnp.dot(o_h, wot_ref[h * hd:(h + 1) * hd, :],
                            preferred_element_type=jnp.float32)     # (Tq, E)

    tgt1 = x_t.astype(jnp.float32) + acc + vec_ref[6:7, :]          # residual (dropout2 = id)

    # FFN: norm3 -> linear1 -> exact (erf) GELU -> linear2 -> residual
    t = ln(tgt1, vec_ref[4:5, :], vec_ref[5:6, :])
    h1 = _mm_t(t, w1_ref[...]) + b1_ref[...]                        # (Tq, F)
    h1 = 0.5 * h1 * (1.0 + lax.erf(h1 * (1.0 / math.sqrt(2.0))))
    y = _mm_t(h1, w2_ref[...]) + vec_ref[7:8, :]                    # (Tq, E)

    o_ref[...] = (tgt1 + y).astype(o_ref.dtype)


# ----------------------------------------------------------------------------
# wrapper: one pallas_call for the whole layer, whole batch
# ----------------------------------------------------------------------------
def transformer_decoder_layer(tgt, memory, p, nhead):
    L, N, E = tgt.shape
    S = memory.shape[0]
    F = p["lin1_w"].shape[0]
    hd = E // nhead

    # Free, contiguous reshapes (no HBM relayout): flattened token r = (l = r // N, n = r % N).
    tgt2d = tgt.reshape(L * N, E)
    mem2d = memory.reshape(S * N, E)

    # Small parameters packed into two tables; out_proj_w transposed once (weight prep,
    # one-time) so per-head slices inside the kernel are sublane slices.
    vec = jnp.stack([p["norm1_w"], p["norm1_b"], p["norm2_w"], p["norm2_b"],
                     p["norm3_w"], p["norm3_b"], p["out_proj_b"], p["lin2_b"]], axis=0)
    bqkv = p["in_proj_b"].reshape(3 * nhead, hd)
    wo_t = p["out_proj_w"].T
    b1 = p["lin1_b"].reshape(1, F)

    kernel = functools.partial(decoder_layer_kernel, nhead=nhead, n_batch=N,
                               scale=1.0 / math.sqrt(hd))

    def full(shape):
        return pl.BlockSpec(shape, lambda i: (0,) * len(shape))

    out2d = pl.pallas_call(
        kernel,
        out_shape=jax.ShapeDtypeStruct((L * N, E), tgt.dtype),
        grid=(1,),                                   # single step: whole layer, whole batch
        in_specs=[
            full((L * N, E)),        # tgt tokens
            full((S * N, E)),        # memory tokens
            full((3 * E, E)),        # packed q|k|v in-projection weight (PyTorch layout)
            full((3 * nhead, hd)),   # packed q|k|v in-projection bias (per-head rows)
            full((E, E)),            # out_proj_w.T
            full((F, E)),            # lin1_w
            full((1, F)),            # lin1_b
            full((E, F)),            # lin2_w
            full((8, E)),            # LayerNorm scales/biases + out_proj_b + lin2_b
        ],
        out_specs=full((L * N, E)),
        compiler_params=pltpu.CompilerParams(
            dimension_semantics=("arbitrary",)),
    )(tgt2d, mem2d, p["in_proj_w"], bqkv, wo_t,
      p["lin1_w"], b1, p["lin2_w"], vec)

    return out2d.reshape(L, N, E)


# ----------------------------------------------------------------------------
# pure-JAX reference for correctness check
# ----------------------------------------------------------------------------
def reference(tgt, memory, p, nhead):
    L, N, E = tgt.shape
    S = memory.shape[0]
    hd = E // nhead

    def ln(x, g, b):
        mu = jnp.mean(x, axis=-1, keepdims=True)
        var = jnp.mean((x - mu) ** 2, axis=-1, keepdims=True)
        return (x - mu) * lax.rsqrt(var + 1e-5) * g + b

    mem_n = ln(memory, p["norm2_w"], p["norm2_b"])
    tgt_n = ln(tgt, p["norm1_w"], p["norm1_b"])

    wq, wk, wv = (p["in_proj_w"][:E], p["in_proj_w"][E:2 * E], p["in_proj_w"][2 * E:])
    bq, bk, bv = (p["in_proj_b"][:E], p["in_proj_b"][E:2 * E], p["in_proj_b"][2 * E:])
    q = tgt_n @ wq.T + bq
    k = mem_n @ wk.T + bk
    v = mem_n @ wv.T + bv
    q = q.reshape(L, N * nhead, hd).transpose(1, 0, 2) * (1.0 / math.sqrt(hd))
    k = k.reshape(S, N * nhead, hd).transpose(1, 0, 2)
    v = v.reshape(S, N * nhead, hd).transpose(1, 0, 2)
    s = jnp.einsum("bld,bsd->bls", q, k)
    pattn = jax.nn.softmax(s, axis=-1)
    attn = jnp.einsum("bls,bsd->bld", pattn, v)
    attn = attn.transpose(1, 0, 2).reshape(L * N, E)
    attn = (attn @ p["out_proj_w"].T + p["out_proj_b"]).reshape(L, N, E)

    tgt1 = tgt + attn
    t = ln(tgt1, p["norm3_w"], p["norm3_b"])
    h = jax.nn.gelu(t @ p["lin1_w"].T + p["lin1_b"], approximate=False)
    return tgt1 + (h @ p["lin2_w"].T + p["lin2_b"])


# ----------------------------------------------------------------------------
# main
# ----------------------------------------------------------------------------
if __name__ == "__main__":
    d_model, nhead, dim_ff = 32, 4, 64
    L, S, N = 8, 8, 2

    key = jax.random.PRNGKey(0)
    ks = jax.random.split(key, 12)
    f32 = jnp.float32

    params = {
        "in_proj_w": jax.random.normal(ks[0], (3 * d_model, d_model), f32) * 0.05,
        "in_proj_b": jax.random.normal(ks[1], (3 * d_model,), f32) * 0.02,
        "out_proj_w": jax.random.normal(ks[2], (d_model, d_model), f32) * 0.05,
        "out_proj_b": jax.random.normal(ks[3], (d_model,), f32) * 0.02,
        "lin1_w": jax.random.normal(ks[4], (dim_ff, d_model), f32) * 0.05,
        "lin1_b": jax.random.normal(ks[5], (dim_ff,), f32) * 0.02,
        "lin2_w": jax.random.normal(ks[6], (d_model, dim_ff), f32) * 0.05,
        "lin2_b": jax.random.normal(ks[7], (d_model,), f32) * 0.02,
        "norm1_w": jnp.ones((d_model,), f32),
        "norm1_b": jnp.zeros((d_model,), f32),
        "norm2_w": jnp.ones((d_model,), f32),
        "norm2_b": jnp.zeros((d_model,), f32),
        "norm3_w": jnp.ones((d_model,), f32),
        "norm3_b": jnp.zeros((d_model,), f32),
    }

    tgt = jax.random.normal(ks[8], (L, N, d_model), f32)
    memory = jax.random.normal(ks[9], (S, N, d_model), f32)

    out = transformer_decoder_layer(tgt, memory, params, nhead)
    out = jax.block_until_ready(out)

    ref = jax.block_until_ready(reference(tgt, memory, params, nhead))
    assert out.shape == (L, N, d_model)
    # tolerance slightly loosened vs f32 reference because the softmax denominator uses
    # the EUP approximate reciprocal (pl.reciprocal(approx=True)).
    assert jnp.allclose(out, ref, rtol=2e-3, atol=2e-3), float(jnp.max(jnp.abs(out - ref)))

    print("KERNEL_OK")
</pallas_src>

<mosaic_0001>
module attributes {stable_mosaic.version = 11 : i64} {
  func.func @decoder_layer_kernel(%arg0: i32, %arg1: memref<16x32xf32, #tpu.memory_space<vmem>>, %arg2: memref<16x32xf32, #tpu.memory_space<vmem>>, %arg3: memref<96x32xf32, #tpu.memory_space<vmem>>, %arg4: memref<12x8xf32, #tpu.memory_space<vmem>>, %arg5: memref<32x32xf32, #tpu.memory_space<vmem>>, %arg6: memref<64x32xf32, #tpu.memory_space<vmem>>, %arg7: memref<1x64xf32, #tpu.memory_space<vmem>>, %arg8: memref<32x64xf32, #tpu.memory_space<vmem>>, %arg9: memref<8x32xf32, #tpu.memory_space<vmem>>, %arg10: memref<16x32xf32, #tpu.memory_space<vmem>>) attributes {dimension_semantics = [#tpu.dimension_semantics<arbitrary>], iteration_bounds = array<i64: 1>, scalar_prefetch = 0 : i64, scratch_operands = 0 : i64, tpu.core_type = #tpu.core_type<tc>, window_params = [{pipeline_mode = #tpu.pipeline_mode<synchronous>, transform_indices = @transform_0, window_bounds = array<i64: 16, 32>}, {pipeline_mode = #tpu.pipeline_mode<synchronous>, transform_indices = @transform_1, window_bounds = array<i64: 16, 32>}, {pipeline_mode = #tpu.pipeline_mode<synchronous>, transform_indices = @transform_2, window_bounds = array<i64: 96, 32>}, {pipeline_mode = #tpu.pipeline_mode<synchronous>, transform_indices = @transform_3, window_bounds = array<i64: 12, 8>}, {pipeline_mode = #tpu.pipeline_mode<synchronous>, transform_indices = @transform_4, window_bounds = array<i64: 32, 32>}, {pipeline_mode = #tpu.pipeline_mode<synchronous>, transform_indices = @transform_5, window_bounds = array<i64: 64, 32>}, {pipeline_mode = #tpu.pipeline_mode<synchronous>, transform_indices = @transform_6, window_bounds = array<i64: 1, 64>}, {pipeline_mode = #tpu.pipeline_mode<synchronous>, transform_indices = @transform_7, window_bounds = array<i64: 32, 64>}, {pipeline_mode = #tpu.pipeline_mode<synchronous>, transform_indices = @transform_8, window_bounds = array<i64: 8, 32>}, {pipeline_mode = #tpu.pipeline_mode<synchronous>, transform_indices = @transform_9, window_bounds = array<i64: 16, 32>}]} {
    %c0 = arith.constant 0 : index
    %c0_0 = arith.constant 0 : index
    %0 = vector.load %arg1[%c0, %c0_0] : memref<16x32xf32, #tpu.memory_space<vmem>>, vector<16x32xf32>
    %c0_1 = arith.constant 0 : index
    %c0_2 = arith.constant 0 : index
    %1 = vector.load %arg2[%c0_1, %c0_2] : memref<16x32xf32, #tpu.memory_space<vmem>>, vector<16x32xf32>
    %c2 = arith.constant 2 : index
    %c0_3 = arith.constant 0 : index
    %2 = vector.load %arg9[%c2, %c0_3] : memref<8x32xf32, #tpu.memory_space<vmem>>, vector<1x32xf32>
    %c3 = arith.constant 3 : index
    %c0_4 = arith.constant 0 : index
    %3 = vector.load %arg9[%c3, %c0_4] : memref<8x32xf32, #tpu.memory_space<vmem>>, vector<1x32xf32>
    %cst = arith.constant dense<0.000000e+00> : vector<16xf32>
    %4 = vector.multi_reduction <add>, %1, %cst [1] : vector<16x32xf32> to vector<16xf32>
    %5 = vector.shape_cast %4 : vector<16xf32> to vector<16x1xf32>
    %cst_5 = arith.constant 3.200000e+01 : f32
    %6 = vector.broadcast %cst_5 : f32 to vector<16x1xf32>
    %7 = arith.divf %5, %6 : vector<16x1xf32>
    %8 = vector.broadcast %7 : vector<16x1xf32> to vector<16x32xf32>
    %9 = arith.subf %1, %8 : vector<16x32xf32>
    %10 = arith.mulf %9, %9 : vector<16x32xf32>
    %cst_6 = arith.constant dense<0.000000e+00> : vector<16xf32>
    %11 = vector.multi_reduction <add>, %10, %cst_6 [1] : vector<16x32xf32> to vector<16xf32>
    %12 = vector.shape_cast %11 : vector<16xf32> to vector<16x1xf32>
    %cst_7 = arith.constant 3.200000e+01 : f32
    %13 = vector.broadcast %cst_7 : f32 to vector<16x1xf32>
    %14 = arith.divf %12, %13 : vector<16x1xf32>
    %cst_8 = arith.constant 9.99999974E-6 : f32
    %15 = vector.broadcast %cst_8 : f32 to vector<16x1xf32>
    %16 = arith.addf %14, %15 : vector<16x1xf32>
    %17 = math.rsqrt %16 : vector<16x1xf32>
    %18 = vector.broadcast %17 : vector<16x1xf32> to vector<16x32xf32>
    %19 = arith.mulf %9, %18 : vector<16x32xf32>
    %20 = vector.broadcast %2 : vector<1x32xf32> to vector<16x32xf32>
    %21 = arith.mulf %19, %20 : vector<16x32xf32>
    %22 = vector.broadcast %3 : vector<1x32xf32> to vector<16x32xf32>
    %23 = arith.addf %21, %22 : vector<16x32xf32>
    %c0_9 = arith.constant 0 : index
    %c0_10 = arith.constant 0 : index
    %24 = vector.load %arg9[%c0_9, %c0_10] : memref<8x32xf32, #tpu.memory_space<vmem>>, vector<1x32xf32>
    %c1 = arith.constant 1 : index
    %c0_11 = arith.constant 0 : index
    %25 = vector.load %arg9[%c1, %c0_11] : memref<8x32xf32, #tpu.memory_space<vmem>>, vector<1x32xf32>
    %cst_12 = arith.constant dense<0.000000e+00> : vector<16xf32>
    %26 = vector.multi_reduction <add>, %0, %cst_12 [1] : vector<16x32xf32> to vector<16xf32>
    %27 = vector.shape_cast %26 : vector<16xf32> to vector<16x1xf32>
    %cst_13 = arith.constant 3.200000e+01 : f32
    %28 = vector.broadcast %cst_13 : f32 to vector<16x1xf32>
    %29 = arith.divf %27, %28 : vector<16x1xf32>
    %30 = vector.broadcast %29 : vector<16x1xf32> to vector<16x32xf32>
    %31 = arith.subf %0, %30 : vector<16x32xf32>
    %32 = arith.mulf %31, %31 : vector<16x32xf32>
    %cst_14 = arith.constant dense<0.000000e+00> : vector<16xf32>
    %33 = vector.multi_reduction <add>, %32, %cst_14 [1] : vector<16x32xf32> to vector<16xf32>
    %34 = vector.shape_cast %33 : vector<16xf32> to vector<16x1xf32>
    %cst_15 = arith.constant 3.200000e+01 : f32
    %35 = vector.broadcast %cst_15 : f32 to vector<16x1xf32>
    %36 = arith.divf %34, %35 : vector<16x1xf32>
    %cst_16 = arith.constant 9.99999974E-6 : f32
    %37 = vector.broadcast %cst_16 : f32 to vector<16x1xf32>
    %38 = arith.addf %36, %37 : vector<16x1xf32>
    %39 = math.rsqrt %38 : vector<16x1xf32>
    %40 = vector.broadcast %39 : vector<16x1xf32> to vector<16x32xf32>
    %41 = arith.mulf %31, %40 : vector<16x32xf32>
    %42 = vector.broadcast %24 : vector<1x32xf32> to vector<16x32xf32>
    %43 = arith.mulf %41, %42 : vector<16x32xf32>
    %44 = vector.broadcast %25 : vector<1x32xf32> to vector<16x32xf32>
    %45 = arith.addf %43, %44 : vector<16x32xf32>
    %46 = tpu.iota {dimensions = array<i32: 0>} : vector<16x16xi32>
    %c2_i32 = arith.constant 2 : i32
    %c0_i32 = arith.constant 0 : i32
    %47 = arith.cmpi eq, %c2_i32, %c0_i32 : i32
    %c1_i32 = arith.constant 1 : i32
    %48 = arith.select %47, %c1_i32, %c2_i32 : i32
    %49 = vector.broadcast %48 : i32 to vector<16x16xi32>
    %50 = arith.remsi %46, %49 : vector<16x16xi32>
    %c0_i32_17 = arith.constant 0 : i32
    %51 = vector.broadcast %c0_i32_17 : i32 to vector<16x16xi32>
    %52 = arith.cmpi ne, %50, %51 : vector<16x16xi32>
    %c0_i32_18 = arith.constant 0 : i32
    %53 = vector.broadcast %c0_i32_18 : i32 to vector<16x16xi32>
    %54 = arith.cmpi slt, %50, %53 : vector<16x16xi32>
    %c0_i32_19 = arith.constant 0 : i32
    %55 = arith.cmpi slt, %48, %c0_i32_19 : i32
    %56 = vector.broadcast %55 : i1 to vector<16x16xi1>
    %57 = vector.broadcast %56 : vector<16x16xi1> to vector<16x16xi1>
    %58 = arith.xori %54, %57 : vector<16x16xi1>
    %59 = arith.andi %58, %52 : vector<16x16xi1>
    %60 = vector.broadcast %48 : i32 to vector<16x16xi32>
    %61 = arith.addi %50, %60 : vector<16x16xi32>
    %62 = arith.select %59, %61, %50 : vector<16x16xi1>, vector<16x16xi32>
    %63 = tpu.iota {dimensions = array<i32: 1>} : vector<16x16xi32>
    %c2_i32_20 = arith.constant 2 : i32
    %c0_i32_21 = arith.constant 0 : i32
    %64 = arith.cmpi eq, %c2_i32_20, %c0_i32_21 : i32
    %c1_i32_22 = arith.constant 1 : i32
    %65 = arith.select %64, %c1_i32_22, %c2_i32_20 : i32
    %66 = vector.broadcast %65 : i32 to vector<16x16xi32>
    %67 = arith.remsi %63, %66 : vector<16x16xi32>
    %c0_i32_23 = arith.constant 0 : i32
    %68 = vector.broadcast %c0_i32_23 : i32 to vector<16x16xi32>
    %69 = arith.cmpi ne, %67, %68 : vector<16x16xi32>
    %c0_i32_24 = arith.constant 0 : i32
    %70 = vector.broadcast %c0_i32_24 : i32 to vector<16x16xi32>
    %71 = arith.cmpi slt, %67, %70 : vector<16x16xi32>
    %c0_i32_25 = arith.constant 0 : i32
    %72 = arith.cmpi slt, %65, %c0_i32_25 : i32
    %73 = vector.broadcast %72 : i1 to vector<16x16xi1>
    %74 = vector.broadcast %73 : vector<16x16xi1> to vector<16x16xi1>
    %75 = arith.xori %71, %74 : vector<16x16xi1>
    %76 = arith.andi %75, %69 : vector<16x16xi1>
    %77 = vector.broadcast %65 : i32 to vector<16x16xi32>
    %78 = arith.addi %67, %77 : vector<16x16xi32>
    %79 = arith.select %76, %78, %67 : vector<16x16xi1>, vector<16x16xi32>
    %80 = arith.cmpi eq, %62, %79 : vector<16x16xi32>
    %cst_26 = arith.constant 0.000000e+00 : f32
    %cst_27 = arith.constant -1.000000e+30 : f32
    %81 = vector.broadcast %cst_26 : f32 to vector<16x16xf32>
    %82 = vector.broadcast %cst_27 : f32 to vector<16x16xf32>
    %83 = arith.select %80, %81, %82 : vector<16x16xi1>, vector<16x16xf32>
    %cst_28 = arith.constant 0.000000e+00 : f32
    %84 = vector.broadcast %cst_28 : f32 to vector<16x32xf32>
    %c0_29 = arith.constant 0 : index
    %c0_30 = arith.constant 0 : index
    %85 = vector.load %arg3[%c0_29, %c0_30] : memref<96x32xf32, #tpu.memory_space<vmem>>, vector<8x32xf32>
    %c32 = arith.constant 32 : index
    %c0_31 = arith.constant 0 : index
    %86 = vector.load %arg3[%c32, %c0_31] : memref<96x32xf32, #tpu.memory_space<vmem>>, vector<8x32xf32>
    %c64 = arith.constant 64 : index
    %c0_32 = arith.constant 0 : index
    %87 = vector.load %arg3[%c64, %c0_32] : memref<96x32xf32, #tpu.memory_space<vmem>>, vector<8x32xf32>
    %c0_33 = arith.constant 0 : index
    %c0_34 = arith.constant 0 : index
    %88 = vector.load %arg4[%c0_33, %c0_34] : memref<12x8xf32, #tpu.memory_space<vmem>>, vector<1x8xf32>
    %c4 = arith.constant 4 : index
    %c0_35 = arith.constant 0 : index
    %89 = vector.load %arg4[%c4, %c0_35] : memref<12x8xf32, #tpu.memory_space<vmem>>, vector<1x8xf32>
    %c8 = arith.constant 8 : index
    %c0_36 = arith.constant 0 : index
    %90 = vector.load %arg4[%c8, %c0_36] : memref<12x8xf32, #tpu.memory_space<vmem>>, vector<1x8xf32>
    %cst_37 = arith.constant dense<0.000000e+00> : vector<16x8xf32>
    %91 = tpu.matmul %45, %85, %cst_37 {dimension_numbers = #tpu.dot_dimension_numbers<[1], [1], [0], [0], [0, 0, 1, 0], [], []>} : vector<16x32xf32>, vector<8x32xf32>, vector<16x8xf32> -> vector<16x8xf32>
    %92 = vector.broadcast %88 : vector<1x8xf32> to vector<16x8xf32>
    %93 = arith.addf %91, %92 : vector<16x8xf32>
    %cst_38 = arith.constant 0.353553385 : f32
    %94 = vector.broadcast %cst_38 : f32 to vector<16x8xf32>
    %95 = arith.mulf %93, %94 : vector<16x8xf32>
    %cst_39 = arith.constant dense<0.000000e+00> : vector<16x8xf32>
    %96 = tpu.matmul %23, %86, %cst_39 {dimension_numbers = #tpu.dot_dimension_numbers<[1], [1], [0], [0], [0, 0, 1, 0], [], []>} : vector<16x32xf32>, vector<8x32xf32>, vector<16x8xf32> -> vector<16x8xf32>
    %97 = vector.broadcast %89 : vector<1x8xf32> to vector<16x8xf32>
    %98 = arith.addf %96, %97 : vector<16x8xf32>
    %cst_40 = arith.constant dense<0.000000e+00> : vector<16x8xf32>
    %99 = tpu.matmul %23, %87, %cst_40 {dimension_numbers = #tpu.dot_dimension_numbers<[1], [1], [0], [0], [0, 0, 1, 0], [], []>} : vector<16x32xf32>, vector<8x32xf32>, vector<16x8xf32> -> vector<16x8xf32>
    %100 = vector.broadcast %90 : vector<1x8xf32> to vector<16x8xf32>
    %101 = arith.addf %99, %100 : vector<16x8xf32>
    %cst_41 = arith.constant dense<0.000000e+00> : vector<16x16xf32>
    %102 = tpu.matmul %95, %98, %cst_41 {dimension_numbers = #tpu.dot_dimension_numbers<[1], [1], [0], [0], [0, 0, 1, 0], [], []>} : vector<16x8xf32>, vector<16x8xf32>, vector<16x16xf32> -> vector<16x16xf32>
    %103 = arith.addf %102, %83 : vector<16x16xf32>
    %cst_42 = arith.constant dense<0xFF800000> : vector<16xf32>
    %104 = vector.multi_reduction <maximumf>, %103, %cst_42 [1] : vector<16x16xf32> to vector<16xf32>
    %105 = vector.shape_cast %104 : vector<16xf32> to vector<16x1xf32>
    %106 = vector.broadcast %105 : vector<16x1xf32> to vector<16x16xf32>
    %107 = arith.subf %103, %106 : vector<16x16xf32>
    %108 = math.exp %107 : vector<16x16xf32>
    %cst_43 = arith.constant dense<0.000000e+00> : vector<16xf32>
    %109 = vector.multi_reduction <add>, %108, %cst_43 [1] : vector<16x16xf32> to vector<16xf32>
    %110 = vector.shape_cast %109 : vector<16xf32> to vector<16x1xf32>
    %111 = tpu.reciprocal %110 {approx = true} : vector<16x1xf32> -> vector<16x1xf32>
    %112 = vector.broadcast %111 : vector<16x1xf32> to vector<16x16xf32>
    %113 = arith.mulf %108, %112 : vector<16x16xf32>
    %cst_44 = arith.constant dense<0.000000e+00> : vector<16x8xf32>
    %114 = tpu.matmul %113, %101, %cst_44 {dimension_numbers = #tpu.dot_dimension_numbers<[1], [0], [0], [1], [0, 0, 1, 1], [], []>} : vector<16x16xf32>, vector<16x8xf32>, vector<16x8xf32> -> vector<16x8xf32>
    %c0_45 = arith.constant 0 : index
    %c0_46 = arith.constant 0 : index
    %115 = vector.load %arg5[%c0_45, %c0_46] : memref<32x32xf32, #tpu.memory_space<vmem>>, vector<8x32xf32>
    %cst_47 = arith.constant dense<0.000000e+00> : vector<16x32xf32>
    %116 = tpu.matmul %114, %115, %cst_47 {dimension_numbers = #tpu.dot_dimension_numbers<[1], [0], [0], [1], [0, 0, 1, 1], [], []>} : vector<16x8xf32>, vector<8x32xf32>, vector<16x32xf32> -> vector<16x32xf32>
    %117 = arith.addf %84, %116 : vector<16x32xf32>
    %c8_48 = arith.constant 8 : index
    %c0_49 = arith.constant 0 : index
    %118 = vector.load %arg3[%c8_48, %c0_49] : memref<96x32xf32, #tpu.memory_space<vmem>>, vector<8x32xf32>
    %c40 = arith.constant 40 : index
    %c0_50 = arith.constant 0 : index
    %119 = vector.load %arg3[%c40, %c0_50] : memref<96x32xf32, #tpu.memory_space<vmem>>, vector<8x32xf32>
    %c72 = arith.constant 72 : index
    %c0_51 = arith.constant 0 : index
    %120 = vector.load %arg3[%c72, %c0_51] : memref<96x32xf32, #tpu.memory_space<vmem>>, vector<8x32xf32>
    %c1_52 = arith.constant 1 : index
    %c0_53 = arith.constant 0 : index
    %121 = vector.load %arg4[%c1_52, %c0_53] : memref<12x8xf32, #tpu.memory_space<vmem>>, vector<1x8xf32>
    %c5 = arith.constant 5 : index
    %c0_54 = arith.constant 0 : index
    %122 = vector.load %arg4[%c5, %c0_54] : memref<12x8xf32, #tpu.memory_space<vmem>>, vector<1x8xf32>
    %c9 = arith.constant 9 : index
    %c0_55 = arith.constant 0 : index
    %123 = vector.load %arg4[%c9, %c0_55] : memref<12x8xf32, #tpu.memory_space<vmem>>, vector<1x8xf32>
    %cst_56 = arith.constant dense<0.000000e+00> : vector<16x8xf32>
    %124 = tpu.matmul %45, %118, %cst_56 {dimension_numbers = #tpu.dot_dimension_numbers<[1], [1], [0], [0], [0, 0, 1, 0], [], []>} : vector<16x32xf32>, vector<8x32xf32>, vector<16x8xf32> -> vector<16x8xf32>
    %125 = vector.broadcast %121 : vector<1x8xf32> to vector<16x8xf32>
    %126 = arith.addf %124, %125 : vector<16x8xf32>
    %cst_57 = arith.constant 0.353553385 : f32
    %127 = vector.broadcast %cst_57 : f32 to vector<16x8xf32>
    %128 = arith.mulf %126, %127 : vector<16x8xf32>
    %cst_58 = arith.constant dense<0.000000e+00> : vector<16x8xf32>
    %129 = tpu.matmul %23, %119, %cst_58 {dimension_numbers = #tpu.dot_dimension_numbers<[1], [1], [0], [0], [0, 0, 1, 0], [], []>} : vector<16x32xf32>, vector<8x32xf32>, vector<16x8xf32> -> vector<16x8xf32>
    %130 = vector.broadcast %122 : vector<1x8xf32> to vector<16x8xf32>
    %131 = arith.addf %129, %130 : vector<16x8xf32>
    %cst_59 = arith.constant dense<0.000000e+00> : vector<16x8xf32>
    %132 = tpu.matmul %23, %120, %cst_59 {dimension_numbers = #tpu.dot_dimension_numbers<[1], [1], [0], [0], [0, 0, 1, 0], [], []>} : vector<16x32xf32>, vector<8x32xf32>, vector<16x8xf32> -> vector<16x8xf32>
    %133 = vector.broadcast %123 : vector<1x8xf32> to vector<16x8xf32>
    %134 = arith.addf %132, %133 : vector<16x8xf32>
    %cst_60 = arith.constant dense<0.000000e+00> : vector<16x16xf32>
    %135 = tpu.matmul %128, %131, %cst_60 {dimension_numbers = #tpu.dot_dimension_numbers<[1], [1], [0], [0], [0, 0, 1, 0], [], []>} : vector<16x8xf32>, vector<16x8xf32>, vector<16x16xf32> -> vector<16x16xf32>
    %136 = arith.addf %135, %83 : vector<16x16xf32>
    %cst_61 = arith.constant dense<0xFF800000> : vector<16xf32>
    %137 = vector.multi_reduction <maximumf>, %136, %cst_61 [1] : vector<16x16xf32> to vector<16xf32>
    %138 = vector.shape_cast %137 : vector<16xf32> to vector<16x1xf32>
    %139 = vector.broadcast %138 : vector<16x1xf32> to vector<16x16xf32>
    %140 = arith.subf %136, %139 : vector<16x16xf32>
    %141 = math.exp %140 : vector<16x16xf32>
    %cst_62 = arith.constant dense<0.000000e+00> : vector<16xf32>
    %142 = vector.multi_reduction <add>, %141, %cst_62 [1] : vector<16x16xf32> to vector<16xf32>
    %143 = vector.shape_cast %142 : vector<16xf32> to vector<16x1xf32>
    %144 = tpu.reciprocal %143 {approx = true} : vector<16x1xf32> -> vector<16x1xf32>
    %145 = vector.broadcast %144 : vector<16x1xf32> to vector<16x16xf32>
    %146 = arith.mulf %141, %145 : vector<16x16xf32>
    %cst_63 = arith.constant dense<0.000000e+00> : vector<16x8xf32>
    %147 = tpu.matmul %146, %134, %cst_63 {dimension_numbers = #tpu.dot_dimension_numbers<[1], [0], [0], [1], [0, 0, 1, 1], [], []>} : vector<16x16xf32>, vector<16x8xf32>, vector<16x8xf32> -> vector<16x8xf32>
    %c8_64 = arith.constant 8 : index
    %c0_65 = arith.constant 0 : index
    %148 = vector.load %arg5[%c8_64, %c0_65] : memref<32x32xf32, #tpu.memory_space<vmem>>, vector<8x32xf32>
    %cst_66 = arith.constant dense<0.000000e+00> : vector<16x32xf32>
    %149 = tpu.matmul %147, %148, %cst_66 {dimension_numbers = #tpu.dot_dimension_numbers<[1], [0], [0], [1], [0, 0, 1, 1], [], []>} : vector<16x8xf32>, vector<8x32xf32>, vector<16x32xf32> -> vector<16x32xf32>
    %150 = arith.addf %117, %149 : vector<16x32xf32>
    %c16 = arith.constant 16 : index
    %c0_67 = arith.constant 0 : index
    %151 = vector.load %arg3[%c16, %c0_67] : memref<96x32xf32, #tpu.memory_space<vmem>>, vector<8x32xf32>
    %c48 = arith.constant 48 : index
    %c0_68 = arith.constant 0 : index
    %152 = vector.load %arg3[%c48, %c0_68] : memref<96x32xf32, #tpu.memory_space<vmem>>, vector<8x32xf32>
    %c80 = arith.constant 80 : index
    %c0_69 = arith.constant 0 : index
    %153 = vector.load %arg3[%c80, %c0_69] : memref<96x32xf32, #tpu.memory_space<vmem>>, vector<8x32xf32>
    %c2_70 = arith.constant 2 : index
    %c0_71 = arith.constant 0 : index
    %154 = vector.load %arg4[%c2_70, %c0_71] : memref<12x8xf32, #tpu.memory_space<vmem>>, vector<1x8xf32>
    %c6 = arith.constant 6 : index
    %c0_72 = arith.constant 0 : index
    %155 = vector.load %arg4[%c6, %c0_72] : memref<12x8xf32, #tpu.memory_space<vmem>>, vector<1x8xf32>
    %c10 = arith.constant 10 : index
    %c0_73 = arith.constant 0 : index
    %156 = vector.load %arg4[%c10, %c0_73] : memref<12x8xf32, #tpu.memory_space<vmem>>, vector<1x8xf32>
    %cst_74 = arith.constant dense<0.000000e+00> : vector<16x8xf32>
    %157 = tpu.matmul %45, %151, %cst_74 {dimension_numbers = #tpu.dot_dimension_numbers<[1], [1], [0], [0], [0, 0, 1, 0], [], []>} : vector<16x32xf32>, vector<8x32xf32>, vector<16x8xf32> -> vector<16x8xf32>
    %158 = vector.broadcast %154 : vector<1x8xf32> to vector<16x8xf32>
    %159 = arith.addf %157, %158 : vector<16x8xf32>
    %cst_75 = arith.constant 0.353553385 : f32
    %160 = vector.broadcast %cst_75 : f32 to vector<16x8xf32>
    %161 = arith.mulf %159, %160 : vector<16x8xf32>
    %cst_76 = arith.constant dense<0.000000e+00> : vector<16x8xf32>
    %162 = tpu.matmul %23, %152, %cst_76 {dimension_numbers = #tpu.dot_dimension_numbers<[1], [1], [0], [0], [0, 0, 1, 0], [], []>} : vector<16x32xf32>, vector<8x32xf32>, vector<16x8xf32> -> vector<16x8xf32>
    %163 = vector.broadcast %155 : vector<1x8xf32> to vector<16x8xf32>
    %164 = arith.addf %162, %163 : vector<16x8xf32>
    %cst_77 = arith.constant dense<0.000000e+00> : vector<16x8xf32>
    %165 = tpu.matmul %23, %153, %cst_77 {dimension_numbers = #tpu.dot_dimension_numbers<[1], [1], [0], [0], [0, 0, 1, 0], [], []>} : vector<16x32xf32>, vector<8x32xf32>, vector<16x8xf32> -> vector<16x8xf32>
    %166 = vector.broadcast %156 : vector<1x8xf32> to vector<16x8xf32>
    %167 = arith.addf %165, %166 : vector<16x8xf32>
    %cst_78 = arith.constant dense<0.000000e+00> : vector<16x16xf32>
    %168 = tpu.matmul %161, %164, %cst_78 {dimension_numbers = #tpu.dot_dimension_numbers<[1], [1], [0], [0], [0, 0, 1, 0], [], []>} : vector<16x8xf32>, vector<16x8xf32>, vector<16x16xf32> -> vector<16x16xf32>
    %169 = arith.addf %168, %83 : vector<16x16xf32>
    %cst_79 = arith.constant dense<0xFF800000> : vector<16xf32>
    %170 = vector.multi_reduction <maximumf>, %169, %cst_79 [1] : vector<16x16xf32> to vector<16xf32>
    %171 = vector.shape_cast %170 : vector<16xf32> to vector<16x1xf32>
    %172 = vector.broadcast %171 : vector<16x1xf32> to vector<16x16xf32>
    %173 = arith.subf %169, %172 : vector<16x16xf32>
    %174 = math.exp %173 : vector<16x16xf32>
    %cst_80 = arith.constant dense<0.000000e+00> : vector<16xf32>
    %175 = vector.multi_reduction <add>, %174, %cst_80 [1] : vector<16x16xf32> to vector<16xf32>
    %176 = vector.shape_cast %175 : vector<16xf32> to vector<16x1xf32>
    %177 = tpu.reciprocal %176 {approx = true} : vector<16x1xf32> -> vector<16x1xf32>
    %178 = vector.broadcast %177 : vector<16x1xf32> to vector<16x16xf32>
    %179 = arith.mulf %174, %178 : vector<16x16xf32>
    %cst_81 = arith.constant dense<0.000000e+00> : vector<16x8xf32>
    %180 = tpu.matmul %179, %167, %cst_81 {dimension_numbers = #tpu.dot_dimension_numbers<[1], [0], [0], [1], [0, 0, 1, 1], [], []>} : vector<16x16xf32>, vector<16x8xf32>, vector<16x8xf32> -> vector<16x8xf32>
    %c16_82 = arith.constant 16 : index
    %c0_83 = arith.constant 0 : index
    %181 = vector.load %arg5[%c16_82, %c0_83] : memref<32x32xf32, #tpu.memory_space<vmem>>, vector<8x32xf32>
    %cst_84 = arith.constant dense<0.000000e+00> : vector<16x32xf32>
    %182 = tpu.matmul %180, %181, %cst_84 {dimension_numbers = #tpu.dot_dimension_numbers<[1], [0], [0], [1], [0, 0, 1, 1], [], []>} : vector<16x8xf32>, vector<8x32xf32>, vector<16x32xf32> -> vector<16x32xf32>
    %183 = arith.addf %150, %182 : vector<16x32xf32>
    %c24 = arith.constant 24 : index
    %c0_85 = arith.constant 0 : index
    %184 = vector.load %arg3[%c24, %c0_85] : memref<96x32xf32, #tpu.memory_space<vmem>>, vector<8x32xf32>
    %c56 = arith.constant 56 : index
    %c0_86 = arith.constant 0 : index
    %185 = vector.load %arg3[%c56, %c0_86] : memref<96x32xf32, #tpu.memory_space<vmem>>, vector<8x32xf32>
    %c88 = arith.constant 88 : index
    %c0_87 = arith.constant 0 : index
    %186 = vector.load %arg3[%c88, %c0_87] : memref<96x32xf32, #tpu.memory_space<vmem>>, vector<8x32xf32>
    %c3_88 = arith.constant 3 : index
    %c0_89 = arith.constant 0 : index
    %187 = vector.load %arg4[%c3_88, %c0_89] : memref<12x8xf32, #tpu.memory_space<vmem>>, vector<1x8xf32>
    %c7 = arith.constant 7 : index
    %c0_90 = arith.constant 0 : index
    %188 = vector.load %arg4[%c7, %c0_90] : memref<12x8xf32, #tpu.memory_space<vmem>>, vector<1x8xf32>
    %c11 = arith.constant 11 : index
    %c0_91 = arith.constant 0 : index
    %189 = vector.load %arg4[%c11, %c0_91] : memref<12x8xf32, #tpu.memory_space<vmem>>, vector<1x8xf32>
    %cst_92 = arith.constant dense<0.000000e+00> : vector<16x8xf32>
    %190 = tpu.matmul %45, %184, %cst_92 {dimension_numbers = #tpu.dot_dimension_numbers<[1], [1], [0], [0], [0, 0, 1, 0], [], []>} : vector<16x32xf32>, vector<8x32xf32>, vector<16x8xf32> -> vector<16x8xf32>
    %191 = vector.broadcast %187 : vector<1x8xf32> to vector<16x8xf32>
    %192 = arith.addf %190, %191 : vector<16x8xf32>
    %cst_93 = arith.constant 0.353553385 : f32
    %193 = vector.broadcast %cst_93 : f32 to vector<16x8xf32>
    %194 = arith.mulf %192, %193 : vector<16x8xf32>
    %cst_94 = arith.constant dense<0.000000e+00> : vector<16x8xf32>
    %195 = tpu.matmul %23, %185, %cst_94 {dimension_numbers = #tpu.dot_dimension_numbers<[1], [1], [0], [0], [0, 0, 1, 0], [], []>} : vector<16x32xf32>, vector<8x32xf32>, vector<16x8xf32> -> vector<16x8xf32>
    %196 = vector.broadcast %188 : vector<1x8xf32> to vector<16x8xf32>
    %197 = arith.addf %195, %196 : vector<16x8xf32>
    %cst_95 = arith.constant dense<0.000000e+00> : vector<16x8xf32>
    %198 = tpu.matmul %23, %186, %cst_95 {dimension_numbers = #tpu.dot_dimension_numbers<[1], [1], [0], [0], [0, 0, 1, 0], [], []>} : vector<16x32xf32>, vector<8x32xf32>, vector<16x8xf32> -> vector<16x8xf32>
    %199 = vector.broadcast %189 : vector<1x8xf32> to vector<16x8xf32>
    %200 = arith.addf %198, %199 : vector<16x8xf32>
    %cst_96 = arith.constant dense<0.000000e+00> : vector<16x16xf32>
    %201 = tpu.matmul %194, %197, %cst_96 {dimension_numbers = #tpu.dot_dimension_numbers<[1], [1], [0], [0], [0, 0, 1, 0], [], []>} : vector<16x8xf32>, vector<16x8xf32>, vector<16x16xf32> -> vector<16x16xf32>
    %202 = arith.addf %201, %83 : vector<16x16xf32>
    %cst_97 = arith.constant dense<0xFF800000> : vector<16xf32>
    %203 = vector.multi_reduction <maximumf>, %202, %cst_97 [1] : vector<16x16xf32> to vector<16xf32>
    %204 = vector.shape_cast %203 : vector<16xf32> to vector<16x1xf32>
    %205 = vector.broadcast %204 : vector<16x1xf32> to vector<16x16xf32>
    %206 = arith.subf %202, %205 : vector<16x16xf32>
    %207 = math.exp %206 : vector<16x16xf32>
    %cst_98 = arith.constant dense<0.000000e+00> : vector<16xf32>
    %208 = vector.multi_reduction <add>, %207, %cst_98 [1] : vector<16x16xf32> to vector<16xf32>
    %209 = vector.shape_cast %208 : vector<16xf32> to vector<16x1xf32>
    %210 = tpu.reciprocal %209 {approx = true} : vector<16x1xf32> -> vector<16x1xf32>
    %211 = vector.broadcast %210 : vector<16x1xf32> to vector<16x16xf32>
    %212 = arith.mulf %207, %211 : vector<16x16xf32>
    %cst_99 = arith.constant dense<0.000000e+00> : vector<16x8xf32>
    %213 = tpu.matmul %212, %200, %cst_99 {dimension_numbers = #tpu.dot_dimension_numbers<[1], [0], [0], [1], [0, 0, 1, 1], [], []>} : vector<16x16xf32>, vector<16x8xf32>, vector<16x8xf32> -> vector<16x8xf32>
    %c24_100 = arith.constant 24 : index
    %c0_101 = arith.constant 0 : index
    %214 = vector.load %arg5[%c24_100, %c0_101] : memref<32x32xf32, #tpu.memory_space<vmem>>, vector<8x32xf32>
    %cst_102 = arith.constant dense<0.000000e+00> : vector<16x32xf32>
    %215 = tpu.matmul %213, %214, %cst_102 {dimension_numbers = #tpu.dot_dimension_numbers<[1], [0], [0], [1], [0, 0, 1, 1], [], []>} : vector<16x8xf32>, vector<8x32xf32>, vector<16x32xf32> -> vector<16x32xf32>
    %216 = arith.addf %183, %215 : vector<16x32xf32>
    %217 = arith.addf %0, %216 : vector<16x32xf32>
    %c6_103 = arith.constant 6 : index
    %c0_104 = arith.constant 0 : index
    %218 = vector.load %arg9[%c6_103, %c0_104] : memref<8x32xf32, #tpu.memory_space<vmem>>, vector<1x32xf32>
    %219 = vector.broadcast %218 : vector<1x32xf32> to vector<16x32xf32>
    %220 = arith.addf %217, %219 : vector<16x32xf32>
    %c4_105 = arith.constant 4 : index
    %c0_106 = arith.constant 0 : index
    %221 = vector.load %arg9[%c4_105, %c0_106] : memref<8x32xf32, #tpu.memory_space<vmem>>, vector<1x32xf32>
    %c5_107 = arith.constant 5 : index
    %c0_108 = arith.constant 0 : index
    %222 = vector.load %arg9[%c5_107, %c0_108] : memref<8x32xf32, #tpu.memory_space<vmem>>, vector<1x32xf32>
    %cst_109 = arith.constant dense<0.000000e+00> : vector<16xf32>
    %223 = vector.multi_reduction <add>, %220, %cst_109 [1] : vector<16x32xf32> to vector<16xf32>
    %224 = vector.shape_cast %223 : vector<16xf32> to vector<16x1xf32>
    %cst_110 = arith.constant 3.200000e+01 : f32
    %225 = vector.broadcast %cst_110 : f32 to vector<16x1xf32>
    %226 = arith.divf %224, %225 : vector<16x1xf32>
    %227 = vector.broadcast %226 : vector<16x1xf32> to vector<16x32xf32>
    %228 = arith.subf %220, %227 : vector<16x32xf32>
    %229 = arith.mulf %228, %228 : vector<16x32xf32>
    %cst_111 = arith.constant dense<0.000000e+00> : vector<16xf32>
    %230 = vector.multi_reduction <add>, %229, %cst_111 [1] : vector<16x32xf32> to vector<16xf32>
    %231 = vector.shape_cast %230 : vector<16xf32> to vector<16x1xf32>
    %cst_112 = arith.constant 3.200000e+01 : f32
    %232 = vector.broadcast %cst_112 : f32 to vector<16x1xf32>
    %233 = arith.divf %231, %232 : vector<16x1xf32>
    %cst_113 = arith.constant 9.99999974E-6 : f32
    %234 = vector.broadcast %cst_113 : f32 to vector<16x1xf32>
    %235 = arith.addf %233, %234 : vector<16x1xf32>
    %236 = math.rsqrt %235 : vector<16x1xf32>
    %237 = vector.broadcast %236 : vector<16x1xf32> to vector<16x32xf32>
    %238 = arith.mulf %228, %237 : vector<16x32xf32>
    %239 = vector.broadcast %221 : vector<1x32xf32> to vector<16x32xf32>
    %240 = arith.mulf %238, %239 : vector<16x32xf32>
    %241 = vector.broadcast %222 : vector<1x32xf32> to vector<16x32xf32>
    %242 = arith.addf %240, %241 : vector<16x32xf32>
    %c0_114 = arith.constant 0 : index
    %c0_115 = arith.constant 0 : index
    %243 = vector.load %arg6[%c0_114, %c0_115] : memref<64x32xf32, #tpu.memory_space<vmem>>, vector<64x32xf32>
    %cst_116 = arith.constant dense<0.000000e+00> : vector<16x64xf32>
    %244 = tpu.matmul %242, %243, %cst_116 {dimension_numbers = #tpu.dot_dimension_numbers<[1], [1], [0], [0], [0, 0, 1, 0], [], []>} : vector<16x32xf32>, vector<64x32xf32>, vector<16x64xf32> -> vector<16x64xf32>
    %c0_117 = arith.constant 0 : index
    %c0_118 = arith.constant 0 : index
    %245 = vector.load %arg7[%c0_117, %c0_118] : memref<1x64xf32, #tpu.memory_space<vmem>>, vector<1x64xf32>
    %246 = vector.broadcast %245 : vector<1x64xf32> to vector<16x64xf32>
    %247 = arith.addf %244, %246 : vector<16x64xf32>
    %cst_119 = arith.constant 5.000000e-01 : f32
    %248 = vector.broadcast %cst_119 : f32 to vector<16x64xf32>
    %249 = arith.mulf %248, %247 : vector<16x64xf32>
    %cst_120 = arith.constant 0.707106769 : f32
    %250 = vector.broadcast %cst_120 : f32 to vector<16x64xf32>
    %251 = arith.mulf %247, %250 : vector<16x64xf32>
    %252 = math.erf %251 : vector<16x64xf32>
    %cst_121 = arith.constant 1.000000e+00 : f32
    %253 = vector.broadcast %cst_121 : f32 to vector<16x64xf32>
    %254 = arith.addf %253, %252 : vector<16x64xf32>
    %255 = arith.mulf %249, %254 : vector<16x64xf32>
    %c0_122 = arith.constant 0 : index
    %c0_123 = arith.constant 0 : index
    %256 = vector.load %arg8[%c0_122, %c0_123] : memref<32x64xf32, #tpu.memory_space<vmem>>, vector<32x64xf32>
    %cst_124 = arith.constant dense<0.000000e+00> : vector<16x32xf32>
    %257 = tpu.matmul %255, %256, %cst_124 {dimension_numbers = #tpu.dot_dimension_numbers<[1], [1], [0], [0], [0, 0, 1, 0], [], []>} : vector<16x64xf32>, vector<32x64xf32>, vector<16x32xf32> -> vector<16x32xf32>
    %c7_125 = arith.constant 7 : index
    %c0_126 = arith.constant 0 : index
    %258 = vector.load %arg9[%c7_125, %c0_126] : memref<8x32xf32, #tpu.memory_space<vmem>>, vector<1x32xf32>
    %259 = vector.broadcast %258 : vector<1x32xf32> to vector<16x32xf32>
    %260 = arith.addf %257, %259 : vector<16x32xf32>
    %261 = arith.addf %220, %260 : vector<16x32xf32>
    %c0_127 = arith.constant 0 : index
    %c0_128 = arith.constant 0 : index
    %262 = vector.load %arg10[%c0_127, %c0_128] : memref<16x32xf32, #tpu.memory_space<vmem>>, vector<16x32xf32>
    tpu.vector_store %arg10[%c0_127, %c0_128], %261 {strides = array<i32>} : memref<16x32xf32, #tpu.memory_space<vmem>>, vector<16x32xf32>,
    return
  }
  func.func @transform_0(%arg0: i32) -> (i32, i32) {
    %c0_i32 = arith.constant 0 : i32
    %c0_i32_0 = arith.constant 0 : i32
    %c0_i32_1 = arith.constant 0 : i32
    return %c0_i32, %c0_i32_0 : i32, i32
  }
  func.func @transform_1(%arg0: i32) -> (i32, i32) {
    %c0_i32 = arith.constant 0 : i32
    %c0_i32_0 = arith.constant 0 : i32
    %c0_i32_1 = arith.constant 0 : i32
    return %c0_i32, %c0_i32_0 : i32, i32
  }
  func.func @transform_2(%arg0: i32) -> (i32, i32) {
    %c0_i32 = arith.constant 0 : i32
    %c0_i32_0 = arith.constant 0 : i32
    %c0_i32_1 = arith.constant 0 : i32
    return %c0_i32, %c0_i32_0 : i32, i32
  }
  func.func @transform_3(%arg0: i32) -> (i32, i32) {
    %c0_i32 = arith.constant 0 : i32
    %c0_i32_0 = arith.constant 0 : i32
    %c0_i32_1 = arith.constant 0 : i32
    return %c0_i32, %c0_i32_0 : i32, i32
  }
  func.func @transform_4(%arg0: i32) -> (i32, i32) {
    %c0_i32 = arith.constant 0 : i32
    %c0_i32_0 = arith.constant 0 : i32
    %c0_i32_1 = arith.constant 0 : i32
    return %c0_i32, %c0_i32_0 : i32, i32
  }
  func.func @transform_5(%arg0: i32) -> (i32, i32) {
    %c0_i32 = arith.constant 0 : i32
    %c0_i32_0 = arith.constant 0 : i32
    %c0_i32_1 = arith.constant 0 : i32
    return %c0_i32, %c0_i32_0 : i32, i32
  }
  func.func @transform_6(%arg0: i32) -> (i32, i32) {
    %c0_i32 = arith.constant 0 : i32
    %c0_i32_0 = arith.constant 0 : i32
    %c0_i32_1 = arith.constant 0 : i32
    return %c0_i32, %c0_i32_0 : i32, i32
  }
  func.func @transform_7(%arg0: i32) -> (i32, i32) {
    %c0_i32 = arith.constant 0 : i32
    %c0_i32_0 = arith.constant 0 : i32
    %c0_i32_1 = arith.constant 0 : i32
    return %c0_i32, %c0_i32_0 : i32, i32
  }
  func.func @transform_8(%arg0: i32) -> (i32, i32) {
    %c0_i32 = arith.constant 0 : i32
    %c0_i32_0 = arith.constant 0 : i32
    %c0_i32_1 = arith.constant 0 : i32
    return %c0_i32, %c0_i32_0 : i32, i32
  }
  func.func @transform_9(%arg0: i32) -> (i32, i32) {
    %c0_i32 = arith.constant 0 : i32
    %c0_i32_0 = arith.constant 0 : i32
    %c0_i32_1 = arith.constant 0 : i32
    return %c0_i32, %c0_i32_0 : i32, i32
  }
}

</mosaic_0001>

<bundles_post_ra>
// kernel: tpu_custom_call.1
= control target key start
LH: loop header
LB: loop body
LE: loop exit
PB: predicated region body
PF: predicated region fallthrough
CT: control target
= control target key end

     0   :  { %vm39_vm0 = vcmask 261120   ;;  %s3570_s0 = inlined_call_operand.vmem [shape: f32[16,32], index: 0, kind: input, shape index: {}]   ;;  %s3571_s1 = inlined_call_operand.vmem [shape: f32[16,32], index: 1, kind: input, shape index: {}]   ;;  %s3572_s2 = inlined_call_operand.vmem [shape: f32[96,32], index: 2, kind: input, shape index: {}]   ;;  %s3573_s3 = inlined_call_operand.vmem [shape: f32[12,8], index: 3, kind: input, shape index: {}]   ;;  %s3574_s4 = inlined_call_operand.vmem [shape: f32[32,32], index: 4, kind: input, shape index: {}]   ;;  %s3575_s5 = inlined_call_operand.vmem [shape: f32[64,32], index: 5, kind: input, shape index: {}]   ;;  %s3576_s6 = inlined_call_operand.vmem [shape: f32[1,64], index: 6, kind: input, shape index: {}]   ;;  %s3577_s7 = inlined_call_operand.vmem [shape: f32[32,64], index: 7, kind: input, shape index: {}]   ;;  %s3578_s8 = inlined_call_operand.vmem [shape: f32[8,32], index: 8, kind: input, shape index: {}]   ;;  %s3579_s9 = inlined_call_operand.hbm [shape: f32[16,32], index: 9, kind: output, shape index: {}]  }
   0x1   :  { %v3170_v0 = vld [vmem:[%s3570_s0] sm:$0xff]  ;;  %v3178_v2 = vld [vmem:[%s3570_s0 + $0x8] sm:$0xff] }
   0x2   :  { %v35_v1 = vld [vmem:[%s3571_s1] sm:$0xff]  ;;  %v81_v3 = vsel %vm39_vm0, %v3170_v0, 0.0  ;;  %v36_v5 = vld [vmem:[%s3571_s1 + $0x8] sm:$0xff] }
   0x3   :  { %v40_v4 = vsel %vm39_vm0, %v35_v1, 0.0 }
   0x4   :  { %14 = vsyncpa [#allocation3], 0  ;;  %82 = vadd.xlane.f32.xlu0 %v81_v3  ;;  %41 = vadd.xlane.f32.xlu1 %v40_v4  ;;  %v84_v6 = vsel %vm39_vm0, %v3178_v2, 0.0  ;;  %v43_v7 = vsel %vm39_vm0, %v36_v5, 0.0  ;;  %v164_v28 = vld [vmem:[%s3572_s2] sm:$0xff]  ;;  %vm430_vm1 = vcmask 64512  }
   0x5   :  { %2789 = vmatprep.subr.msk.mxu0 %vm39_vm0, %v164_v28  ;;  %v165_v29 = vld [vmem:[%s3572_s2 + $0x20] sm:$0xff]  ;;  %vm3254_vm2 = vmpackc.low %vm430_vm1, %vm430_vm1  ;;  %vm518_vm5 = vcmask 130048   ;;  %vm2474_vm7 = vcmask 523264   ;;  %s3114_s14 = smov [#allocation2]  }
   0x6   :  { %2790 = vmatpush3.xpose.msk.msra.mxu0 %vm39_vm0, %v164_v28  ;;  %v2590_v43 = vld [vmem:[%s3578_s8] ss:$0 sm:$0xff]  ;;  %v2591_v45 = vld [vmem:[%s3578_s8 + $0x1] ss:$0 sm:$0xff]  ;;  %v2588_v49 = vld [vmem:[%s3578_s8 + $0x2] ss:$0 sm:$0xff] }
   0x7   :  { %2794 = vmatprep.subr.msk.mxu0 %vm39_vm0, %v165_v29  ;;  %v2589_v53 = vld [vmem:[%s3578_s8 + $0x3] ss:$0 sm:$0xff]  ;;  %v2592_v63 = vld [vmem:[%s3573_s3] ss:$0 sm:$0xff]  ;;  %vm3482_vm6 = vmpackc.low %vm39_vm0, %vm39_vm0  ;;  %s2577_s15 = sshll.u32 %s3114_s14, 4  ;;  %s2578_s15 = int_to_ptr.vmem [resolvable:$true] %s2577_s15 }
   0x8   :  { %85 = vadd.xlane.f32.xlu0 %v84_v6  ;;  %44 = vadd.xlane.f32.xlu1 %v43_v7  ;;  %v166_v60 = vld [vmem:[%s3572_s2 + $0x40] sm:$0xff]  ;;  %vm3020_vm8 = vmpackc.low %vm2474_vm7, %vm2474_vm7  ;;  %s3089_s16 = scalar_lea.vmem %s2578_s15, 256  ;;  %p3094_p1 = scmp.lt.s32.totalorder %s2578_s15, %s2578_s15 }
   0x9   :  { %p3090_p0 = scmp.ne.s32.totalorder %s2578_s15, %s3089_s16  ;;  %p3095_p2 = scmp.lt.s32.totalorder %s3089_s16, %s3089_s16 }
   0xb   :  { %p3096_p3 = por %p3095_p2, %p3094_p1 }
   0xd   :  { %p3097_p4 = pnand %p3096_p3, %p3090_p0 }
  0x91   :  { %v83_v8 = vpop.xlane.xlu0 %82  ;;  %v42_v9 = vpop.xlane.xlu1 %41 }
  0x92   :  { %v87_v10 = vmul.f32 0.03125, %v83_v8  ;;  %v47_v11 = vmul.f32 0.03125, %v42_v9 }
  0x94   :  { %v89_v12 = vsub.f32 %v3170_v0, %v87_v10  ;;  %v49_v13 = vsub.f32 %v35_v1, %v47_v11  ;;  %v2600_v11 = vld [vmem:[%s3573_s3 + $0x8] ss:$0 sm:$0xff] }
  0x95   :  { %v86_v14 = vpop.xlane.xlu0 %85  ;;  %v45_v15 = vpop.xlane.xlu1 %44 }
  0x96   :  { %v88_v16 = vmul.f32 0.03125, %v86_v14  ;;  %v48_v17 = vmul.f32 0.03125, %v45_v15  ;;  %v91_v18 = vmul.f32 %v89_v12, %v89_v12  ;;  %v51_v19 = vmul.f32 %v49_v13, %v49_v13 }
  0x98   :  { %v90_v20 = vsub.f32 %v3178_v2, %v88_v16  ;;  %v50_v21 = vsub.f32 %v36_v5, %v48_v17  ;;  %v93_v22 = vsel %vm39_vm0, %v91_v18, 0.0  ;;  %v53_v23 = vsel %vm39_vm0, %v51_v19, 0.0  ;;  %v2596_v5 = vld [vmem:[%s3573_s3 + $0x4] ss:$0 sm:$0xff]  ;;  %v624_v17 = vld [vmem:[%s3572_s2 + $0x28] sm:$0xff] }
  0x99   :  { %94 = vadd.xlane.f32.xlu0 %v93_v22  ;;  %v119_v22 = vlaneseq }
  0x9a   :  { %v92_v24 = vmul.f32 %v90_v20, %v90_v20  ;;  %v52_v25 = vmul.f32 %v50_v21, %v50_v21 }
  0x9c   :  { %v96_v26 = vsel %vm39_vm0, %v92_v24, 0.0  ;;  %v56_v27 = vsel %vm39_vm0, %v52_v25, 0.0  ;;  %v147_v25 = vand.u32 127, %v119_v22 }
  0x9d   :  { %54 = vadd.xlane.f32.xlu0 %v53_v23  ;;  %97 = vadd.xlane.f32.xlu1 %v96_v26  ;;  %v120_v23 = vshrl.u32 %v119_v22, 7 }
  0x9f   :  { %v121_v24 = vadd.s32 8, %v120_v23  ;;  %v126_v28 = vand.u32 1, %v120_v23 }
  0xa1   :  { %57 = vadd.xlane.f32.xlu1 %v56_v27  ;;  %v133_v26 = vand.u32 1, %v121_v24  ;;  %v152_v27 = vand.u32 1, %v147_v25 }
  0xa3   :  { %vm161_vm3 = vcmp.eq.s32.totalorder %v133_v26, %v152_v27  ;;  %vm160_vm4 = vcmp.eq.s32.totalorder %v126_v28, %v152_v27  ;;  %v2632_v27 = vld [vmem:[%s3573_s3 + $0x2] ss:$0 sm:$0xff] }
 0x126   :  { %v95_v30 = vpop.xlane.xlu0 %94 }
 0x127   :  { %v99_v31 = vmul.f32 0.03125, %v95_v30 }
 0x129   :  { %v101_v32 = vadd.f32 1e-05, %v99_v31 }
 0x12a   :  { %v98_v33 = vpop.xlane.xlu1 %97  ;;  %v55_v34 = vpop.xlane.xlu0 %54 }
 0x12b   :  { %3041 = vrsqrt.f32 %v101_v32  ;;  %v100_v35 = vmul.f32 0.03125, %v98_v33  ;;  %v59_v36 = vmul.f32 0.03125, %v55_v34 }
 0x12d   :  { %v102_v37 = vadd.f32 1e-05, %v100_v35  ;;  %v61_v38 = vadd.f32 1e-05, %v59_v36  ;;  %v2614_v36 = vld [vmem:[%s3573_s3 + $0x5] ss:$0 sm:$0xff] }
 0x12e   :  { %v58_v39 = vpop.xlane.xlu1 %57 }
 0x12f   :  { %3043 = vrsqrt.f32 %v102_v37  ;;  %v60_v40 = vmul.f32 0.03125, %v58_v39 }
 0x130   :  { %3045 = vrsqrt.f32 %v61_v38 }
 0x131   :  { %v62_v41 = vadd.f32 1e-05, %v60_v40 }
 0x133   :  { %3047 = vrsqrt.f32 %v62_v41 }
 0x135   :  { %v3042_v42 = vpop.eup %3041 }
 0x136   :  { %v105_v44 = vmul.f32 %v3042_v42, %v89_v12 }
 0x138   :  { %v111_v46 = vmul.f32 %v2590_v43, %v105_v44 }
 0x139   :  { %v3044_v47 = vpop.eup %3043 }
 0x13a   :  { %v3046_v48 = vpop.eup %3045  ;;  %v3213_v50 = vadd.f32 %v2591_v45, %v111_v46  ;;  %v106_v51 = vmul.f32 %v3044_v47, %v90_v20 }
 0x13b   :  { %v65_v52 = vmul.f32 %v3046_v48, %v49_v13 }
 0x13c   :  { %2791 = vmatprep.mubr.msk.f32.mxu0 %vm39_vm0, %v3213_v50  ;;  %v112_v54 = vmul.f32 %v2590_v43, %v106_v51 }
 0x13d   :  { %v3048_v55 = vpop.eup %3047  ;;  %v71_v56 = vmul.f32 %v2588_v49, %v65_v52 }
 0x13e   :  { %v66_v57 = vmul.f32 %v3048_v55, %v50_v21  ;;  %v3220_v58 = vadd.f32 %v2591_v45, %v112_v54  ;;  %v623_v55 = vld [vmem:[%s3572_s2 + $0x8] sm:$0xff] }
 0x13f   :  { %v3222_v59 = vadd.f32 %v2589_v53, %v71_v56 }
 0x140   :  { %v72_v61 = vmul.f32 %v2588_v49, %v66_v57  ;;  %2792 = vmatmul.mubr.msk.f32.vlgmr.msra.gmra.mrb[0].mxu0 %vm39_vm0, %v3220_v58 }
 0x141   :  { %2795 = vmatpush3.xpose.msk.msra.mxu0 %vm39_vm0, %v165_v29  ;;  %2796 = vmatprep.mubr.msk.f32.mxu0 %vm39_vm0, %v3222_v59  ;;  %v3113_v29 = vmov -1e+30  }
 0x142   :  { %v3232_v62 = vadd.f32 %v2589_v53, %v72_v61  ;;  %2799 = vmatprep.subr.msk.mxu0 %vm39_vm0, %v166_v60  ;;  %v3272_v30 = vsel %vm161_vm3, 0.0, %v3113_v29  ;;  %v3274_v31 = vsel %vm160_vm4, 0.0, %v3113_v29 }
 0x144   :  { %2797 = vmatmul.mubr.msk.f32.vlgmr.msra.gmra.mrb[2].mxu0 %vm39_vm0, %v3232_v62 }
 0x145   :  { %2800 = vmatpush3.xpose.msk.msra.mxu0 %vm39_vm0, %v166_v60  ;;  %2801 = vmatprep.mubr.msk.f32.mxu0 %vm39_vm0, %v3222_v59 }
 0x148   :  { %2802 = vmatmul.mubr.msk.f32.vlgmr.msra.gmra.mrb[4].mxu0 %vm39_vm0, %v3232_v62 }
 0x213   :  { %v2793_v1 = vpop.f32.mrb[0].mxu0 }
 0x214   :  { %v249_v3 = vpop.f32.mrb[1].mxu0  ;;  %v255_v19 = vadd.f32 %v2793_v1, %v2592_v63 }
 0x215   :  { %v250_v4 = vadd.f32 %v2592_v63, %v249_v3  ;;  %v625_v3 = vld [vmem:[%s3572_s2 + $0x48] sm:$0xff] }
 0x216   :  { %v259_v21 = vmul.f32 0.35355338, %v255_v19 }
 0x217   :  { %v258_v6 = vmul.f32 0.35355338, %v250_v4  ;;  %v2798_v7 = vpop.f32.mrb[2].mxu0  ;;  %v1230_v4 = vld [vmem:[%s3572_s2 + $0x10] sm:$0xff] }
 0x218   :  { %v345_v8 = vadd.f32 %v2798_v7, %v2596_v5  ;;  %v339_v9 = vpop.f32.mrb[3].mxu0  ;;  %v2610_v7 = vld [vmem:[%s3573_s3 + $0x1] ss:$0 sm:$0xff] }
 0x219   :  { %v340_v10 = vadd.f32 %v2596_v5, %v339_v9  ;;  %2808 = vmatprep.mubr.msk.f32.mxu1 %vm430_vm1, %v258_v6 }
 0x21b   :  { %v2803_v13 = vpop.f32.mrb[4].mxu0  ;;  %v2955_v14 = vpack.c.bf16 %v345_v8, %v340_v10 }
 0x21c   :  { %v427_v15 = vadd.f32 %v2803_v13, %v2600_v11  ;;  %v421_v16 = vpop.f32.mrb[5].mxu0  ;;  %v2618_v13 = vld [vmem:[%s3573_s3 + $0x9] ss:$0 sm:$0xff] }
 0x21d   :  { %v422_v18 = vadd.f32 %v2600_v11, %v421_v16  ;;  %2957 = vmatprep.subr.msk.bf16.mxu1 %vm3254_vm2, %v2955_v14 }
 0x21e   :  { %2960 = vmatpush3.bf16.xpose.msk.msra.mxu1 %vm3254_vm2, %v2955_v14 }
 0x21f   :  { %v2961_v20 = vpack.c.bf16 %v427_v15, %v422_v18  ;;  %2823 = vmatprep.subr.msk.mxu1 %vm39_vm0, %v624_v17 }
 0x221   :  { %2962 = vmatprep.subr.bf16.mxu0 %v2961_v20 }
 0x222   :  { %2964 = vmatpush3.bf16.msra.mxu0 %v2961_v20  ;;  %v1231_v20 = vld [vmem:[%s3572_s2 + $0x30] sm:$0xff] }
 0x223   :  { %2818 = vmatprep.subr.msk.mxu0 %vm39_vm0, %v623_v55 }
 0x225   :  { %2809 = vmatmul.mubr.msk.f32.vlgmr.msra.gmra.mrb[0].mxu1 %vm430_vm1, %v259_v21 }
 0x226   :  { %2824 = vmatpush3.xpose.msk.msra.mxu1 %vm39_vm0, %v624_v17  ;;  %2825 = vmatprep.mubr.msk.f32.mxu1 %vm39_vm0, %v3222_v59 }
 0x229   :  { %2826 = vmatmul.mubr.msk.f32.vlgmr.msra.gmra.mrb[2].mxu1 %vm39_vm0, %v3232_v62 }
 0x2f8   :  { %v2810_v32 = vpop.f32.mrb[0].mxu1 }
 0x2f9   :  { %v515_v33 = vadd.f32 %v2810_v32, %v3272_v30  ;;  %v509_v34 = vpop.f32.mrb[1].mxu1 }
 0x2fa   :  { %v510_v35 = vadd.f32 %v509_v34, %v3274_v31  ;;  %v2636_v34 = vld [vmem:[%s3573_s3 + $0x6] ss:$0 sm:$0xff] }
 0x2fb   :  { %v522_v37 = vsel %vm518_vm5, %v515_v33, -inf }
 0x2fc   :  { %523 = vmax.xlane.f32.xlu1 %v522_v37  ;;  %v2827_v38 = vpop.f32.mrb[2].mxu1  ;;  %v519_v39 = vsel %vm518_vm5, %v510_v35, -inf }
 0x2fd   :  { %v792_v40 = vadd.f32 %v2827_v38, %v2614_v36  ;;  %v786_v41 = vpop.f32.mrb[3].mxu1  ;;  %520 = vmax.xlane.f32.xlu0 %v519_v39 }
 0x2fe   :  { %v787_v42 = vadd.f32 %v2614_v36, %v786_v41  ;;  %v1758_v41 = vld [vmem:[%s3572_s2 + $0x18] sm:$0xff] }
 0x300   :  { %v2965_v43 = vpack.c.bf16 %v792_v40, %v787_v42 }
 0x302   :  { %2967 = vmatprep.subr.msk.bf16.mxu1 %vm3254_vm2, %v2965_v43 }
 0x303   :  { %2970 = vmatpush3.bf16.xpose.msk.msra.mxu1 %vm3254_vm2, %v2965_v43 }
 0x304   :  { %2857 = vmatprep.subr.msk.mxu1 %vm39_vm0, %v1230_v4 }
 0x389   :  { %v524_v44 = vpop.xlane.xlu1 %523 }
 0x38a   :  { %v526_v45 = vsub.f32 %v515_v33, %v524_v44  ;;  %v521_v46 = vpop.xlane.xlu0 %520  ;;  %v1760_v44 = vld [vmem:[%s3572_s2 + $0x58] sm:$0xff] }
 0x38b   :  { %v525_v47 = vsub.f32 %v510_v35, %v521_v46 }
 0x38c   :  { %v529_v48 = vmul.f32 1.442695, %v526_v45 }
 0x38d   :  { %v527_v49 = vmul.f32 1.442695, %v525_v47 }
 0x38e   :  { %3049 = vpow2.f32 %v529_v48 }
 0x38f   :  { %3051 = vpow2.f32 %v527_v49 }
 0x398   :  { %v3050_v51 = vpop.eup %3049 }
 0x399   :  { %v3052_v52 = vpop.eup %3051  ;;  %v534_v53 = vsel %vm518_vm5, %v3050_v51, 0.0 }
 0x39a   :  { %535 = vadd.xlane.f32.xlu1 %v534_v53  ;;  %v531_v54 = vsel %vm518_vm5, %v3052_v52, 0.0 }
 0x39b   :  { %532 = vadd.xlane.f32.xlu0 %v531_v54 }
 0x427   :  { %v536_v56 = vpop.xlane.xlu1 %535 }
 0x428   :  { %3053 = vrcp.f32 %v536_v56  ;;  %v533_v57 = vpop.xlane.xlu0 %532 }
 0x429   :  { %3055 = vrcp.f32 %v533_v57 }
 0x432   :  { %v3054_v60 = vpop.eup %3053 }
 0x433   :  { %v3056_v61 = vpop.eup %3055  ;;  %v540_v1 = vmul.f32 %v3054_v60, %v3050_v51  ;;  %v3380_v60 = vld [vmem:[%s3573_s3 + $0x3] ss:$0 sm:$0xff] }
 0x434   :  { %v539_v63 = vmul.f32 %v3056_v61, %v3052_v52 }
 0x436   :  { %2815 = vmatprep.mubr.msk.f32.mxu0 %vm518_vm5, %v539_v63 }
 0x437   :  { %2816 = vmatmul.mubr.msk.f32.vlgmr.msra.gmra.mrb[6].mxu0 %vm518_vm5, %v540_v1 }
 0x438   :  { %2819 = vmatpush3.xpose.msk.msra.mxu0 %vm39_vm0, %v623_v55  ;;  %2820 = vmatprep.mubr.msk.f32.mxu0 %vm39_vm0, %v3213_v50 }
 0x439   :  { %2828 = vmatprep.subr.msk.mxu0 %vm39_vm0, %v625_v3 }
 0x43b   :  { %2821 = vmatmul.mubr.msk.f32.vlgmr.msra.gmra.mrb[8].mxu0 %vm39_vm0, %v3220_v58 }
 0x43c   :  { %2829 = vmatpush3.xpose.msk.msra.mxu0 %vm39_vm0, %v625_v3  ;;  %2830 = vmatprep.mubr.msk.f32.mxu0 %vm39_vm0, %v3222_v59 }
 0x43f   :  { %2831 = vmatmul.mubr.msk.f32.vlgmr.msra.gmra.mrb[10].mxu0 %vm39_vm0, %v3232_v62 }
 0x50a   :  { %v3313_v5 = vpop.f32.mrb[6].mxu0 }
 0x50b   :  { %v3315_v6 = vpop.f32.mrb[7].mxu0 }
 0x50e   :  { %v2822_v8 = vpop.f32.mrb[8].mxu0 }
 0x50f   :  { %v708_v9 = vadd.f32 %v2822_v8, %v2610_v7  ;;  %v702_v10 = vpop.f32.mrb[9].mxu0 }
 0x510   :  { %v703_v11 = vadd.f32 %v2610_v7, %v702_v10  ;;  %v2660_v7 = vld [vmem:[%s3573_s3 + $0xb] ss:$0 sm:$0xff] }
 0x511   :  { %v712_v16 = vmul.f32 0.35355338, %v708_v9 }
 0x512   :  { %v711_v14 = vmul.f32 0.35355338, %v703_v11  ;;  %v2832_v15 = vpop.f32.mrb[10].mxu0 }
 0x513   :  { %v874_v17 = vadd.f32 %v2832_v15, %v2618_v13  ;;  %v868_v18 = vpop.f32.mrb[11].mxu0 }
 0x514   :  { %v869_v19 = vadd.f32 %v2618_v13, %v868_v18  ;;  %2837 = vmatprep.mubr.msk.f32.mxu1 %vm430_vm1, %v711_v14  ;;  %v1067_v14 = vld [vmem:[%s3574_s4 + $0x8] sm:$0xff] }
 0x515   :  { %2838 = vmatmul.mubr.msk.f32.vlgmr.msra.gmra.mrb[4].mxu1 %vm430_vm1, %v712_v16 }
 0x516   :  { %v2971_v21 = vpack.c.bf16 %v874_v17, %v869_v19  ;;  %2858 = vmatpush3.xpose.msk.msra.mxu1 %vm39_vm0, %v1230_v4  ;;  %2859 = vmatprep.mubr.msk.f32.mxu1 %vm39_vm0, %v3213_v50 }
 0x517   :  { %2862 = vmatprep.subr.msk.mxu1 %vm39_vm0, %v1231_v20 }
 0x518   :  { %2972 = vmatprep.subr.bf16.mxu0 %v2971_v21 }
 0x519   :  { %2974 = vmatpush3.bf16.msra.mxu0 %v2971_v21  ;;  %2860 = vmatmul.mubr.msk.f32.vlgmr.msra.gmra.mrb[6].mxu1 %vm39_vm0, %v3220_v58 }
 0x51a   :  { %2863 = vmatpush3.xpose.msk.msra.mxu1 %vm39_vm0, %v1231_v20  ;;  %2864 = vmatprep.mubr.msk.f32.mxu1 %vm39_vm0, %v3222_v59 }
 0x51b   :  { %2847 = vmatprep.subr.mxu0 %v1067_v14 }
 0x51d   :  { %2865 = vmatmul.mubr.msk.f32.vlgmr.msra.gmra.mrb[8].mxu1 %vm39_vm0, %v3232_v62 }
 0x5e8   :  { %v2839_v22 = vpop.f32.mrb[4].mxu1 }
 0x5e9   :  { %v961_v23 = vadd.f32 %v2839_v22, %v3272_v30  ;;  %v955_v24 = vpop.f32.mrb[5].mxu1 }
 0x5ea   :  { %v956_v25 = vadd.f32 %v955_v24, %v3274_v31 }
 0x5eb   :  { %v967_v26 = vsel %vm518_vm5, %v961_v23, -inf }
 0x5ec   :  { %968 = vmax.xlane.f32.xlu1 %v967_v26  ;;  %v2861_v28 = vpop.f32.mrb[6].mxu1  ;;  %v964_v29 = vsel %vm518_vm5, %v956_v25, -inf }
 0x5ed   :  { %v1309_v32 = vpop.f32.mrb[7].mxu1  ;;  %965 = vmax.xlane.f32.xlu0 %v964_v29  ;;  %v1315_v42 = vadd.f32 %v2861_v28, %v2632_v27 }
 0x5ee   :  { %v1310_v33 = vadd.f32 %v2632_v27, %v1309_v32 }
 0x5ef   :  { %v1319_v43 = vmul.f32 0.35355338, %v1315_v42 }
 0x5f0   :  { %v1318_v35 = vmul.f32 0.35355338, %v1310_v33  ;;  %v2866_v36 = vpop.f32.mrb[8].mxu1  ;;  %v622_v33 = vld [vmem:[%s3574_s4] sm:$0xff] }
 0x5f1   :  { %v1399_v37 = vadd.f32 %v2866_v36, %v2636_v34  ;;  %v1393_v38 = vpop.f32.mrb[9].mxu1  ;;  %v1232_v36 = vld [vmem:[%s3572_s2 + $0x50] sm:$0xff] }
 0x5f2   :  { %v1394_v39 = vadd.f32 %v2636_v34, %v1393_v38  ;;  %2876 = vmatprep.mubr.msk.f32.mxu1 %vm430_vm1, %v1318_v35 }
 0x5f4   :  { %v2975_v40 = vpack.c.bf16 %v1399_v37, %v1394_v39 }
 0x5f6   :  { %2977 = vmatprep.subr.msk.bf16.mxu1 %vm3254_vm2, %v2975_v40 }
 0x5f7   :  { %2980 = vmatpush3.bf16.xpose.msk.msra.mxu1 %vm3254_vm2, %v2975_v40  ;;  %v2640_v40 = vld [vmem:[%s3573_s3 + $0xa] ss:$0 sm:$0xff] }
 0x5f8   :  { %2891 = vmatprep.subr.msk.mxu1 %vm39_vm0, %v1758_v41 }
 0x5fe   :  { %2877 = vmatmul.mubr.msk.f32.vlgmr.msra.gmra.mrb[10].mxu1 %vm430_vm1, %v1319_v43 }
 0x5ff   :  { %2892 = vmatpush3.xpose.msk.msra.mxu1 %vm39_vm0, %v1758_v41  ;;  %2893 = vmatprep.mubr.msk.f32.mxu1 %vm39_vm0, %v3213_v50 }
 0x600   :  { %2901 = vmatprep.subr.msk.mxu1 %vm39_vm0, %v1760_v44 }
 0x602   :  { %2894 = vmatmul.mubr.msk.f32.vlgmr.msra.gmra.mrb[12].mxu1 %vm39_vm0, %v3220_v58 }
 0x603   :  { %2902 = vmatpush3.xpose.msk.msra.mxu1 %vm39_vm0, %v1760_v44  ;;  %2903 = vmatprep.mubr.msk.f32.mxu1 %vm39_vm0, %v3222_v59 }
 0x606   :  { %2904 = vmatmul.mubr.msk.f32.vlgmr.msra.gmra.mrb[14].mxu1 %vm39_vm0, %v3232_v62 }
 0x679   :  { %v969_v45 = vpop.xlane.xlu1 %968 }
 0x67a   :  { %v971_v46 = vsub.f32 %v961_v23, %v969_v45  ;;  %v966_v47 = vpop.xlane.xlu0 %965 }
 0x67b   :  { %v970_v48 = vsub.f32 %v956_v25, %v966_v47 }
 0x67c   :  { %v974_v49 = vmul.f32 1.442695, %v971_v46  ;;  %v1674_v46 = vld [vmem:[%s3574_s4 + $0x10] sm:$0xff] }
 0x67d   :  { %v972_v51 = vmul.f32 1.442695, %v970_v48  ;;  %v1759_v48 = vld [vmem:[%s3572_s2 + $0x38] sm:$0xff] }
 0x67e   :  { %3057 = vpow2.f32 %v974_v49 }
 0x67f   :  { %3059 = vpow2.f32 %v972_v51 }
 0x688   :  { %v3058_v50 = vpop.eup %3057 }
 0x689   :  { %v3060_v52 = vpop.eup %3059  ;;  %v979_v58 = vsel %vm518_vm5, %v3058_v50, 0.0 }
 0x68a   :  { %980 = vadd.xlane.f32.xlu1 %v979_v58  ;;  %v976_v53 = vsel %vm518_vm5, %v3060_v52, 0.0  ;;  %v2656_v58 = vld [vmem:[%s3573_s3 + $0x7] ss:$0 sm:$0xff] }
 0x68b   :  { %977 = vadd.xlane.f32.xlu0 %v976_v53 }
 0x6d1   :  { %v2878_v54 = vpop.f32.mrb[10].mxu1 }
 0x6d2   :  { %v1568_v55 = vadd.f32 %v2878_v54, %v3272_v30  ;;  %v1562_v56 = vpop.f32.mrb[11].mxu1 }
 0x6d3   :  { %v1563_v57 = vadd.f32 %v1562_v56, %v3274_v31 }
 0x6d4   :  { %v1574_v61 = vsel %vm518_vm5, %v1568_v55, -inf }
 0x6d5   :  { %1575 = vmax.xlane.f32.xlu1 %v1574_v61  ;;  %v2895_v63 = vpop.f32.mrb[12].mxu1  ;;  %v1571_v1 = vsel %vm518_vm5, %v1563_v57, -inf }
 0x6d6   :  { %v3385_v3 = vadd.f32 %v2895_v63, %v3380_v60  ;;  %v3387_v4 = vpop.f32.mrb[13].mxu1  ;;  %1572 = vmax.xlane.f32.xlu0 %v1571_v1 }
 0x6d9   :  { %v2905_v8 = vpop.f32.mrb[14].mxu1 }
 0x6da   :  { %v2009_v9 = vadd.f32 %v2905_v8, %v2660_v7  ;;  %v2003_v10 = vpop.f32.mrb[15].mxu1 }
 0x6db   :  { %v2004_v11 = vadd.f32 %v2660_v7, %v2003_v10 }
 0x6dd   :  { %v2991_v13 = vpack.c.bf16 %v2009_v9, %v2004_v11 }
 0x6df   :  { %2992 = vmatprep.subr.bf16.mxu1 %v2991_v13 }
 0x6e0   :  { %2994 = vmatpush3.bf16.msra.mxu1 %v2991_v13 }
 0x717   :  { %v981_v15 = vpop.xlane.xlu1 %980 }
 0x718   :  { %3061 = vrcp.f32 %v981_v15  ;;  %v978_v16 = vpop.xlane.xlu0 %977 }
 0x719   :  { %3063 = vrcp.f32 %v978_v16 }
 0x722   :  { %v3062_v17 = vpop.eup %3061 }
 0x723   :  { %v3064_v18 = vpop.eup %3063  ;;  %v985_v20 = vmul.f32 %v3062_v17, %v3058_v50  ;;  %v1838_v50 = vadd.f32 %v3380_v60, %v3387_v4 }
 0x724   :  { %v984_v19 = vmul.f32 %v3064_v18, %v3060_v52 }
 0x725   :  { %v1846_v52 = vmul.f32 0.35355338, %v1838_v50  ;;  %v2342_v50 = vld [vmem:[%s3575_s5 + $0x38] sm:$0xff] }
 0x726   :  { %2844 = vmatprep.mubr.msk.f32.mxu0 %vm518_vm5, %v984_v19 }
 0x727   :  { %2845 = vmatmul.mubr.msk.f32.vlgmr.msra.gmra.mrb[12].mxu0 %vm518_vm5, %v985_v20 }
 0x728   :  { %2848 = vmatpush3.msra.mxu0 %v1067_v14  ;;  %v2202_v14 = vld [vmem:[%s3574_s4 + $0x18] sm:$0xff] }
 0x729   :  { %2852 = vmatprep.subr.mxu0 %v622_v33 }
 0x762   :  { %v1576_v21 = vpop.xlane.xlu1 %1575 }
 0x763   :  { %v1578_v22 = vsub.f32 %v1568_v55, %v1576_v21  ;;  %v1573_v23 = vpop.xlane.xlu0 %1572 }
 0x764   :  { %v1577_v24 = vsub.f32 %v1563_v57, %v1573_v23 }
 0x765   :  { %v1581_v25 = vmul.f32 1.442695, %v1578_v22 }
 0x766   :  { %v1579_v26 = vmul.f32 1.442695, %v1577_v24  ;;  %v2672_v24 = vld [vmem:[%s3578_s8 + $0x6] ss:$0 sm:$0xff] }
 0x767   :  { %3065 = vpow2.f32 %v1581_v25 }
 0x768   :  { %3067 = vpow2.f32 %v1579_v26 }
 0x771   :  { %v3066_v27 = vpop.eup %3065 }
 0x772   :  { %v3068_v28 = vpop.eup %3067  ;;  %v1586_v29 = vsel %vm518_vm5, %v3066_v27, 0.0 }
 0x773   :  { %1587 = vadd.xlane.f32.xlu1 %v1586_v29  ;;  %v1583_v32 = vsel %vm518_vm5, %v3068_v28, 0.0 }
 0x774   :  { %1584 = vadd.xlane.f32.xlu0 %v1583_v32 }
 0x7fa   :  { %v2846_v34 = vpop.f32.mrb[12].mxu0 }
 0x7fb   :  { %v1058_v35 = vpop.f32.mrb[13].mxu0 }
 0x7fc   :  { %2849 = vmatprep.mubr.msk.f32.mxu0 %vm430_vm1, %v1058_v35 }
 0x7fd   :  { %2850 = vmatmul.mubr.msk.f32.vlgmr.msra.gmra.mrb[14].mxu0 %vm430_vm1, %v2846_v34  ;;  %v2335_v34 = vld [vmem:[%s3575_s5] sm:$0xff] }
 0x7fe   :  { %2853 = vmatpush3.msra.mxu0 %v622_v33  ;;  %2854 = vmatprep.mubr.msk.f32.mxu0 %vm430_vm1, %v3315_v6 }
 0x7ff   :  { %2867 = vmatprep.subr.msk.mxu0 %vm39_vm0, %v1232_v36 }
 0x800   :  { %v1588_v6 = vpop.xlane.xlu1 %1587 }
 0x801   :  { %v1585_v37 = vpop.xlane.xlu0 %1584 }
 0x802   :  { %3069 = vrcp.f32 %v1585_v37  ;;  %v2338_v37 = vld [vmem:[%s3575_s5 + $0x18] sm:$0xff] }
 0x803   :  { %3071 = vrcp.f32 %v1588_v6 }
 0x805   :  { %2855 = vmatmul.mubr.msk.f32.vlgmr.msra.gmra.mrb[14].mxu0 %vm430_vm1, %v3313_v5 }
 0x806   :  { %2868 = vmatpush3.xpose.msk.msra.mxu0 %vm39_vm0, %v1232_v36  ;;  %2869 = vmatprep.mubr.msk.f32.mxu0 %vm39_vm0, %v3222_v59  ;;  %v2337_v36 = vld [vmem:[%s3575_s5 + $0x10] sm:$0xff] }
 0x809   :  { %2870 = vmatmul.mubr.msk.f32.vlgmr.msra.gmra.mrb[16].mxu0 %vm39_vm0, %v3232_v62 }
 0x80c   :  { %v3070_v38 = vpop.eup %3069 }
 0x80d   :  { %v1591_v39 = vmul.f32 %v3070_v38, %v3068_v28  ;;  %v3072_v45 = vpop.eup %3071  ;;  %v3001_v38 = vpack.c.bf16 %v2338_v37, %v2337_v36 }
 0x80e   :  { %v1592_v47 = vmul.f32 %v3072_v45, %v3066_v27 }
 0x80f   :  { %2883 = vmatprep.mubr.msk.f32.mxu0 %vm518_vm5, %v1591_v39 }
 0x8dc   :  { %v2871_v41 = vpop.f32.mrb[16].mxu0 }
 0x8dd   :  { %v1481_v5 = vadd.f32 %v2871_v41, %v2640_v40  ;;  %v1475_v42 = vpop.f32.mrb[17].mxu0 }
 0x8de   :  { %v1476_v43 = vadd.f32 %v2640_v40, %v1475_v42 }
 0x8e0   :  { %v2981_v44 = vpack.c.bf16 %v1481_v5, %v1476_v43 }
 0x8e2   :  { %2982 = vmatprep.subr.bf16.mxu0 %v2981_v44 }
 0x8e3   :  { %2984 = vmatpush3.bf16.msra.mxu0 %v2981_v44 }
 0x8e4   :  { %2886 = vmatprep.subr.mxu0 %v1674_v46 }
 0x8e6   :  { %2884 = vmatmul.mubr.msk.f32.vlgmr.msra.gmra.mrb[18].mxu0 %vm518_vm5, %v1592_v47  ;;  %v2339_v47 = vld [vmem:[%s3575_s5 + $0x20] sm:$0xff] }
 0x8e7   :  { %2887 = vmatpush3.msra.mxu0 %v1674_v46 }
 0x8e8   :  { %2896 = vmatprep.subr.msk.mxu0 %vm39_vm0, %v1759_v48 }
 0x9b9   :  { %v2885_v49 = vpop.f32.mrb[18].mxu0 }
 0x9ba   :  { %v1665_v51 = vpop.f32.mrb[19].mxu0 }
 0x9bb   :  { %2888 = vmatprep.mubr.msk.f32.mxu0 %vm430_vm1, %v1665_v51  ;;  %v2341_v51 = vld [vmem:[%s3575_s5 + $0x30] sm:$0xff] }
 0x9bc   :  { %2889 = vmatmul.mubr.msk.f32.vlgmr.msra.gmra.mrb[14].mxu0 %vm430_vm1, %v2885_v49 }
 0x9bd   :  { %2897 = vmatpush3.xpose.msk.msra.mxu0 %vm39_vm0, %v1759_v48  ;;  %2898 = vmatprep.mubr.msk.f32.mxu0 %vm39_vm0, %v3222_v59  ;;  %v1847_v59 = vmul.f32 0.35355338, %v3385_v3  ;;  %v2340_v48 = vld [vmem:[%s3575_s5 + $0x28] sm:$0xff] }
 0x9be   :  { %v3007_v49 = vpack.c.bf16 %v2340_v48, %v2339_v47 }
 0x9c0   :  { %2899 = vmatmul.mubr.msk.f32.vlgmr.msra.gmra.mrb[20].mxu0 %vm39_vm0, %v3232_v62 }
 0x9c1   :  { %2910 = vmatprep.mubr.msk.f32.mxu0 %vm430_vm1, %v1846_v52  ;;  %v3013_v52 = vpack.c.bf16 %v2342_v50, %v2341_v51 }
 0xa93   :  { %v2900_v53 = vpop.f32.mrb[20].mxu0 }
 0xa94   :  { %v1927_v54 = vadd.f32 %v2900_v53, %v2656_v58  ;;  %v1921_v55 = vpop.f32.mrb[21].mxu0 }
 0xa95   :  { %v1922_v56 = vadd.f32 %v2656_v58, %v1921_v55 }
 0xa97   :  { %v2985_v57 = vpack.c.bf16 %v1927_v54, %v1922_v56 }
 0xa99   :  { %2987 = vmatprep.subr.msk.bf16.mxu0 %vm3254_vm2, %v2985_v57 }
 0xa9a   :  { %2990 = vmatpush3.bf16.xpose.msk.msra.mxu0 %vm3254_vm2, %v2985_v57 }
 0xa9b   :  { %2920 = vmatprep.subr.mxu0 %v2202_v14 }
 0xaa1   :  { %2911 = vmatmul.mubr.msk.f32.vlgmr.msra.gmra.mrb[22].mxu0 %vm430_vm1, %v1847_v59 }
 0xaa2   :  { %2921 = vmatpush3.msra.mxu0 %v2202_v14 }
 0xb74   :  { %v2912_v62 = vpop.f32.mrb[22].mxu0 }
 0xb75   :  { %v2096_v60 = vadd.f32 %v2912_v62, %v3272_v30  ;;  %v2090_v61 = vpop.f32.mrb[23].mxu0  ;;  %v2673_v62 = vld [vmem:[%s3578_s8 + $0x4] ss:$0 sm:$0xff] }
 0xb76   :  { %v2091_v63 = vadd.f32 %v2090_v61, %v3274_v31 }
 0xb77   :  { %v2102_v1 = vsel %vm518_vm5, %v2096_v60, -inf }
 0xb78   :  { %2103 = vmax.xlane.f32.xlu1 %v2102_v1  ;;  %v2099_v4 = vsel %vm518_vm5, %v2091_v63, -inf  ;;  %v2674_v1 = vld [vmem:[%s3578_s8 + $0x5] ss:$0 sm:$0xff] }
 0xb79   :  { %2100 = vmax.xlane.f32.xlu0 %v2099_v4 }
 0xc05   :  { %v2104_v7 = vpop.xlane.xlu1 %2103 }
 0xc06   :  { %v2106_v8 = vsub.f32 %v2096_v60, %v2104_v7  ;;  %v2101_v12 = vpop.xlane.xlu0 %2100 }
 0xc07   :  { %v2105_v9 = vsub.f32 %v2091_v63, %v2101_v12 }
 0xc08   :  { %v2109_v10 = vmul.f32 1.442695, %v2106_v8 }
 0xc09   :  { %v2107_v3 = vmul.f32 1.442695, %v2105_v9  ;;  %v2465_v9 = vld [vmem:[%s3577_s7] sm:$0xff] }
 0xc0a   :  { %3073 = vpow2.f32 %v2109_v10  ;;  %v2466_v10 = vld [vmem:[%s3577_s7 + $0x8] sm:$0xff] }
 0xc0b   :  { %3075 = vpow2.f32 %v2107_v3  ;;  %v3019_v3 = vpack.c.bf16 %v2466_v10, %v2465_v9 }
 0xc0d   :  { %3021 = vmatprep.subr.msk.bf16.mxu0 %vm3020_vm8, %v3019_v3 }
 0xc14   :  { %v3074_v11 = vpop.eup %3073 }
 0xc15   :  { %v3076_v13 = vpop.eup %3075  ;;  %v2114_v30 = vsel %vm518_vm5, %v3074_v11, 0.0 }
 0xc16   :  { %2115 = vadd.xlane.f32.xlu1 %v2114_v30  ;;  %v2111_v31 = vsel %vm518_vm5, %v3076_v13, 0.0 }
 0xc17   :  { %2112 = vadd.xlane.f32.xlu0 %v2111_v31  ;;  %v2675_v31 = vld [vmem:[%s3576_s6] ss:$0 sm:$0xff] }
 0xca3   :  { %v2116_v15 = vpop.xlane.xlu1 %2115 }
 0xca4   :  { %3077 = vrcp.f32 %v2116_v15  ;;  %v2113_v16 = vpop.xlane.xlu0 %2112 }
 0xca5   :  { %3079 = vrcp.f32 %v2113_v16 }
 0xcae   :  { %v3078_v17 = vpop.eup %3077 }
 0xcaf   :  { %v3080_v18 = vpop.eup %3079  ;;  %v2120_v20 = vmul.f32 %v3078_v17, %v3074_v11  ;;  %v2467_v11 = vld [vmem:[%s3577_s7 + $0x10] sm:$0xff] }
 0xcb0   :  { %v2119_v19 = vmul.f32 %v3080_v18, %v3076_v13  ;;  %v2468_v13 = vld [vmem:[%s3577_s7 + $0x18] sm:$0xff] }
 0xcb1   :  { %v3025_v30 = vpack.c.bf16 %v2468_v13, %v2467_v11 }
 0xcb2   :  { %2917 = vmatprep.mubr.msk.f32.mxu1 %vm518_vm5, %v2119_v19 }
 0xcb3   :  { %2918 = vmatmul.mubr.msk.f32.vlgmr.msra.gmra.mrb[16].mxu1 %vm518_vm5, %v2120_v20 }
 0xd86   :  { %v2919_v21 = vpop.f32.mrb[16].mxu1 }
 0xd87   :  { %v2193_v22 = vpop.f32.mrb[17].mxu1 }
 0xd88   :  { %2922 = vmatprep.mubr.msk.f32.mxu0 %vm430_vm1, %v2193_v22 }
 0xd89   :  { %2923 = vmatmul.mubr.msk.f32.vlgmr.msra.gmra.mrb[14].mxu0 %vm430_vm1, %v2919_v21 }
 0xd8a   :  { %3024 = vmatpush3.bf16.xpose.msk.msra.mxu0 %vm3020_vm8, %v3019_v3 }
 0xd8b   :  { %3027 = vmatprep.subr.msk.bf16.mxu0 %vm3020_vm8, %v3025_v30 }
 0xd92   :  { %3030 = vmatpush3.bf16.xpose.msk.msra.mxu0 %vm3020_vm8, %v3025_v30 }
 0xe5c   :  { %v2924_v23 = vpop.f32.mrb[14].mxu0 }
 0xe5d   :  { %v2287_v25 = vadd.f32 %v2924_v23, %v3178_v2  ;;  %v2275_v26 = vpop.f32.mrb[15].mxu0 }
 0xe5e   :  { %v2286_v27 = vadd.f32 %v2275_v26, %v3170_v0  ;;  %v2336_v0 = vld [vmem:[%s3575_s5 + $0x8] sm:$0xff] }
 0xe5f   :  { %v3466_v28 = vadd.f32 %v2672_v24, %v2287_v25  ;;  %v2995_v35 = vpack.c.bf16 %v2336_v0, %v2335_v34 }
 0xe60   :  { %v3468_v29 = vadd.f32 %v2672_v24, %v2286_v27 }
 0xe61   :  { %v2300_v32 = vsel %vm39_vm0, %v3466_v28, 0.0  ;;  %2997 = vmatprep.subr.msk.bf16.mxu1 %vm3482_vm6, %v2995_v35 }
 0xe62   :  { %2301 = vadd.xlane.f32.xlu1 %v2300_v32  ;;  %v2297_v33 = vsel %vm39_vm0, %v3468_v29, 0.0  ;;  %3000 = vmatpush3.bf16.xpose.msk.msra.mxu1 %vm3482_vm6, %v2995_v35  ;;  %v2686_v32 = vld [vmem:[%s3578_s8 + $0x7] ss:$0 sm:$0xff] }
 0xe63   :  { %2298 = vadd.xlane.f32.xlu0 %v2297_v33  ;;  %3003 = vmatprep.subr.msk.bf16.mxu1 %vm3482_vm6, %v3001_v38 }
 0xe6a   :  { %3006 = vmatpush3.bf16.xpose.msk.msra.mxu1 %vm3482_vm6, %v3001_v38 }
 0xe6b   :  { %3009 = vmatprep.subr.msk.bf16.mxu1 %vm3482_vm6, %v3007_v49 }
 0xe72   :  { %3012 = vmatpush3.bf16.xpose.msk.msra.mxu1 %vm3482_vm6, %v3007_v49 }
 0xe73   :  { %3015 = vmatprep.subr.msk.bf16.mxu1 %vm3482_vm6, %v3013_v52 }
 0xe7a   :  { %3018 = vmatpush3.bf16.xpose.msk.msra.mxu1 %vm3482_vm6, %v3013_v52 }
 0xeef   :  { %v2302_v39 = vpop.xlane.xlu1 %2301 }
 0xef0   :  { %v2304_v6 = vmul.f32 0.03125, %v2302_v39  ;;  %v2299_v40 = vpop.xlane.xlu0 %2298 }
 0xef1   :  { %v2303_v41 = vmul.f32 0.03125, %v2299_v40 }
 0xef2   :  { %v2306_v5 = vsub.f32 %v3466_v28, %v2304_v6 }
 0xef3   :  { %v2305_v42 = vsub.f32 %v3468_v29, %v2303_v41 }
 0xef4   :  { %v2308_v43 = vmul.f32 %v2306_v5, %v2306_v5 }
 0xef5   :  { %v2307_v44 = vmul.f32 %v2305_v42, %v2305_v42 }
 0xef6   :  { %v2312_v45 = vsel %vm39_vm0, %v2308_v43, 0.0 }
 0xef7   :  { %2313 = vadd.xlane.f32.xlu1 %v2312_v45  ;;  %v2309_v46 = vsel %vm39_vm0, %v2307_v44, 0.0 }
 0xef8   :  { %2310 = vadd.xlane.f32.xlu0 %v2309_v46 }
 0xf84   :  { %v2314_v58 = vpop.xlane.xlu1 %2313 }
 0xf85   :  { %v2316_v53 = vmul.f32 0.03125, %v2314_v58  ;;  %v2311_v54 = vpop.xlane.xlu0 %2310 }
 0xf86   :  { %v2315_v55 = vmul.f32 0.03125, %v2311_v54 }
 0xf87   :  { %v2318_v56 = vadd.f32 1e-05, %v2316_v53 }
 0xf88   :  { %v2317_v57 = vadd.f32 1e-05, %v2315_v55 }
 0xf89   :  { %3081 = vrsqrt.f32 %v2318_v56 }
 0xf8a   :  { %3083 = vrsqrt.f32 %v2317_v57 }
 0xf93   :  { %v3082_v59 = vpop.eup %3081 }
 0xf94   :  { %v3084_v60 = vpop.eup %3083  ;;  %v2322_v61 = vmul.f32 %v3082_v59, %v2306_v5 }
 0xf95   :  { %v2321_v63 = vmul.f32 %v3084_v60, %v2305_v42 }
 0xf96   :  { %v2328_v4 = vmul.f32 %v2673_v62, %v2322_v61 }
 0xf97   :  { %v2327_v7 = vmul.f32 %v2673_v62, %v2321_v63 }
 0xf98   :  { %v2334_v12 = vadd.f32 %v2674_v1, %v2328_v4 }
 0xf99   :  { %v2333_v8 = vadd.f32 %v2674_v1, %v2327_v7 }
 0xf9b   :  { %2941 = vmatprep.mubr.msk.f32.mxu1 %vm39_vm0, %v2333_v8 }
 0xf9c   :  { %2942 = vmatmul.mubr.msk.f32.vlgmr.msra.gmra.mrb[18].mxu1 %vm39_vm0, %v2334_v12 }
0x106f   :  { %v2943_v14 = vpop.f32.mrb[18].mxu1 }
0x1070   :  { %v2452_v15 = vadd.f32 %v2943_v14, %v2675_v31  ;;  %v2446_v16 = vpop.f32.mrb[19].mxu1 }
0x1071   :  { %v2447_v17 = vadd.f32 %v2675_v31, %v2446_v16 }
0x1072   :  { %v2458_v18 = vmul.f32 0.70710677, %v2452_v15  ;;  %v2456_v25 = vmul.f32 0.5, %v2452_v15 }
0x1073   :  { %v2457_v19 = vmul.f32 0.70710677, %v2447_v17  ;;  %v2455_v23 = vmul.f32 0.5, %v2447_v17 }
0x1074   :  { %3085 = verf.f32 %v2458_v18 }
0x1075   :  { %3087 = verf.f32 %v2457_v19 }
0x107e   :  { %v3086_v20 = vpop.eup %3085 }
0x107f   :  { %v3088_v21 = vpop.eup %3087  ;;  %v2462_v22 = vadd.f32 1.0, %v3086_v20 }
0x1080   :  { %v2461_v24 = vadd.f32 1.0, %v3088_v21 }
0x1081   :  { %v2464_v27 = vmul.f32 %v2462_v22, %v2456_v25 }
0x1082   :  { %v2463_v26 = vmul.f32 %v2461_v24, %v2455_v23 }
0x1084   :  { %2952 = vmatprep.mubr.msk.f32.mxu0 %vm2474_vm7, %v2463_v26 }
0x1085   :  { %2953 = vmatmul.mubr.msk.f32.vlgmr.msra.gmra.mrb[24].mxu0 %vm2474_vm7, %v2464_v27 }
0x1158   :  { %v2954_v33 = vpop.f32.mrb[24].mxu0 }
0x1159   :  { %v2565_v34 = vadd.f32 %v2954_v33, %v2686_v32  ;;  %v2559_v0 = vpop.f32.mrb[25].mxu0 }
0x115a   :  { %v2560_v2 = vadd.f32 %v2686_v32, %v2559_v0 }
0x115b   :  { %v2569_v35 = vadd.f32 %v2565_v34, %v3466_v28 }
0x115c   :  { %v2568_v36 = vadd.f32 %v2560_v2, %v3468_v29 }
0x115d   :  { %2571 = vst.msk [vmem:[#allocation2 + $0x8] sm:$0xff] %vm39_vm0, %v2569_v35 }
0x115e   :  { %2570 = vst.msk [vmem:[#allocation2] sm:$0xff] %vm39_vm0, %v2568_v36 }
0x115f   :  { %3100 = shalt.err (!%p3097_p4)
}
0x1160   :  { %s3101_s1 = scalar_lea.hbm %s3579_s9, 256 }
0x1161   :  { %p3102_p5 = scmp.ne.s32.totalorder %s3579_s9, %s3101_s1  ;;  %p3105_p6 = scmp.lt.u32.totalorder %s3101_s1, %s3579_s9 }
0x1163   :  { %p3107_p7 = pnand %p3105_p6, %p3102_p5 }
0x1165   :  { %3110 = shalt.err (!%p3107_p7)
}
0x1166   :  { %s3115_s21 = smov 128   ;;  %s3116_s22 = smov 8  }
0x1167   :  { %2583 = dma.vmem_to_hbm [thread:$0]  %s2578_s15, 256, %s3579_s9, [#allocation3], %s3115_s21, %s3115_s21, %s3116_s22  }
0x1168   :  { %3111 = dma.done.wait [#allocation3], 256  }
0x1169   :  { %3112 = vsyncadd [#allocation3], 4294967040 }
0x116a   :  { %2587 = vsyncpa [#allocation3], 1 }

</bundles_post_ra>
